<compile_context>
chip_gen: v7x
topology: tpu7x:2x2x1
jax: 0.10.0
libtpu: 0.0.40
codegen_flags: <defaults>
</compile_context>

<pallas_src>
import functools

import jax
import jax.numpy as jnp
from jax.experimental import pallas as pl
from jax.experimental.pallas import tpu as pltpu


# --------------------------------------------------------------------------
# Parameter prep (one-time, hoisted out of the per-call path)
# --------------------------------------------------------------------------
def _pack_weights_s2d(w_hwio):
    """(3, 3, Cin, Cout) -> (4, 4*Cin, Cout) packed for the 4 window offsets
    of a 2x2 space-to-depth input.

    Tap (kh, kw) lands at window offset (kh//2, kw//2) and parity channel
    block (kh%2, kw%2); positions with no tap stay zero, so the zero-padded
    rows/cols of the space-to-depth tensor never contribute.
    """
    Cin, Cout = w_hwio.shape[2], w_hwio.shape[3]
    wp = jnp.zeros((2, 2, 2, 2, Cin, Cout), w_hwio.dtype)
    for kh in range(3):
        for kw in range(3):
            wp = wp.at[kh // 2, kw // 2, kh % 2, kw % 2].set(w_hwio[kh, kw])
    return wp.reshape(4, 4 * Cin, Cout)


def prepare_params(params, *, compute_dtype=jnp.bfloat16):
    """Returns (w1p, b1, w2p, b2):
      w1p: (16*Cin, Cmid)    conv1 weights packed for the 4-window im2col (K=48)
      w2p: (4, 4*Cmid, Cout) conv2 weights packed per shifted window  (K=256)
    """
    w1, b1, w2, b2 = params
    Cmid, Cout = w1.shape[-1], w2.shape[-1]
    w1p = _pack_weights_s2d(w1).reshape(-1, Cmid).astype(compute_dtype)
    w2p = _pack_weights_s2d(w2).astype(compute_dtype)
    return (w1p, b1.reshape(1, Cmid).astype(jnp.float32),
            w2p, b2.reshape(1, Cout).astype(jnp.float32))


# --------------------------------------------------------------------------
# Input prep (bf16 pad + space-to-depth + 4-window im2col + parity regroup)
# --------------------------------------------------------------------------
def _prep_conv1_im2col(x_nhwc, compute_dtype):
    """(N, H, W, Cin) -> (N, 4, H//4, W//4, 16*Cin).

    Group g = 2*(y%2) + (x%2) of the conv1 output pixel (y, x), ordered so the
    conv1 matmul output is already laid out as the 2x2 space-to-depth of the
    zero-padded h1 that conv2 consumes (stored group-by-group in the kernel).
    """
    N, H, W, Cin = x_nhwc.shape
    assert H % 4 == 0 and W % 4 == 0, "fused kernel needs H, W divisible by 4"
    H1, W1 = H // 2, W // 2            # conv1 output size
    H2, W2 = H1 // 2, W1 // 2          # conv2 output size
    x = x_nhwc.astype(compute_dtype)   # cast BEFORE pad/relayout (halves bytes)
    xp = jnp.pad(x, ((0, 0), (1, 1), (1, 1), (0, 0)))
    # 2x2 space-to-depth of the padded input: (N, H1+1, W1+1, 4*Cin)
    s1 = xp.reshape(N, H1 + 1, 2, W1 + 1, 2, Cin)
    s1 = jnp.transpose(s1, (0, 1, 3, 2, 4, 5)).reshape(N, H1 + 1, W1 + 1, 4 * Cin)
    # 4-window im2col: conv1 output pixel (y, x) reads s1[y+di, x+dj, :]
    w1win = jnp.concatenate(
        [s1[:, di:di + H1, dj:dj + W1, :] for di in range(2) for dj in range(2)],
        axis=-1)                                           # (N, H1, W1, 16*Cin)
    # Parity regroup: group (u, v) holds conv1 pixels (2a+u, 2b+v).
    g = w1win.reshape(N, H2, 2, W2, 2, 16 * Cin)
    g = jnp.transpose(g, (0, 2, 4, 1, 3, 5))
    return g.reshape(N, 4, H2, W2, 16 * Cin)


# --------------------------------------------------------------------------
# Fused kernel: conv1 -> (in-VMEM s2d of h1) -> conv2
# --------------------------------------------------------------------------
def _fused_down4x_kernel(x1_ref, w1p_ref, b1_ref, w2p_ref, b2_ref, o_ref,
                         s2_ref, *, Bblk, H2, W2, K1, Cmid, Cout):
    """
    x1_ref : (Bblk, 4, H2, W2, K1)       conv1 im2col, parity-grouped (bf16)
    w1p_ref: (K1, Cmid)                  conv1 packed weights (bf16)
    b1_ref : (1, Cmid)                   conv1 bias (f32)
    w2p_ref: (4, 4*Cmid, Cout)           conv2 packed weights (bf16)
    b2_ref : (1, Cout)                   conv2 bias (f32)
    o_ref  : (Bblk, H2*W2, Cout)         conv2 output (f32)
    s2_ref : (Bblk, H2+1, W2+1, 4*Cmid)  VMEM scratch: s2d of zero-padded h1
    """
    HW = H2 * W2

    # ---- conv1: one MXU dot over the whole block (M = Bblk*4*H2*W2, K = K1).
    lhs1 = x1_ref[...].reshape(Bblk * 4 * HW, K1)
    h1 = jnp.dot(lhs1, w1p_ref[...], preferred_element_type=jnp.float32)
    h1 = jnp.maximum(h1 + b1_ref[...], 0.0).astype(s2_ref.dtype)
    h1 = h1.reshape(Bblk, 4, H2, W2, Cmid)

    # ---- scatter h1 into the space-to-depth layout of its zero-padded self.
    s2_ref[...] = jnp.zeros_like(s2_ref)          # padding fringe stays zero
    for u in range(2):
        for v in range(2):
            cg = ((1 - u) * 2 + (1 - v)) * Cmid   # parity channel block
            s2_ref[:, u:u + H2, v:v + W2, cg:cg + Cmid] = h1[:, 2 * u + v]

    # ---- conv2: 4 accumulating dots over contiguous shifted windows (K=4*Cmid).
    acc = jnp.zeros((Bblk * HW, Cout), jnp.float32)
    for di in range(2):
        for dj in range(2):
            patch = s2_ref[:, di:di + H2, dj:dj + W2, :]
            acc += jnp.dot(patch.reshape(Bblk * HW, 4 * Cmid),
                           w2p_ref[di * 2 + dj],
                           preferred_element_type=jnp.float32)
    acc = jnp.maximum(acc + b2_ref[...], 0.0)
    o_ref[...] = acc.reshape(Bblk, HW, Cout).astype(o_ref.dtype)


# --------------------------------------------------------------------------
# Wrapper
# --------------------------------------------------------------------------
def downsampling_network_forward(x_nchw, prepared, *,
                                 compute_dtype=jnp.bfloat16,
                                 images_per_block=None):
    """Forward pass matching the PyTorch module (NCHW in / NCHW out)."""
    w1p, b1, w2p, b2 = prepared
    K1, Cmid = w1p.shape
    Cout = w2p.shape[-1]
    N, _, H, W = x_nchw.shape
    H2, W2 = H // 4, W // 4

    if images_per_block is None:
        # Keep >=2 grid steps when possible so both v7x TensorCores are used;
        # on v5e/v6e the per-step overhead difference is negligible here.
        images_per_block = N // 2 if (N >= 2 and N % 2 == 0) else 1
    Bblk = images_per_block
    assert N % Bblk == 0, "batch must be divisible by images_per_block"

    x1 = _prep_conv1_im2col(jnp.transpose(x_nchw, (0, 2, 3, 1)), compute_dtype)

    kernel = functools.partial(_fused_down4x_kernel, Bblk=Bblk, H2=H2, W2=W2,
                               K1=K1, Cmid=Cmid, Cout=Cout)

    cost = pl.CostEstimate(
        flops=2 * N * H2 * W2 * (4 * K1 * Cmid + 16 * Cmid * Cout),
        transcendentals=0,
        bytes_accessed=(x1.size * 2 + w1p.size * 2 + w2p.size * 2
                        + b1.size * 4 + b2.size * 4
                        + N * H2 * W2 * Cout * 4))

    out_flat = pl.pallas_call(
        kernel,
        out_shape=jax.ShapeDtypeStruct((N, H2 * W2, Cout), jnp.float32),
        grid=(N // Bblk,),
        in_specs=[
            pl.BlockSpec((Bblk, 4, H2, W2, K1), lambda n: (n, 0, 0, 0, 0)),
            pl.BlockSpec((K1, Cmid), lambda n: (0, 0)),
            pl.BlockSpec((1, Cmid), lambda n: (0, 0)),
            pl.BlockSpec((4, 4 * Cmid, Cout), lambda n: (0, 0, 0)),
            pl.BlockSpec((1, Cout), lambda n: (0, 0)),
        ],
        out_specs=pl.BlockSpec((Bblk, H2 * W2, Cout), lambda n: (n, 0, 0)),
        scratch_shapes=[
            pltpu.VMEM((Bblk, H2 + 1, W2 + 1, 4 * Cmid), compute_dtype)],
        compiler_params=pltpu.CompilerParams(
            dimension_semantics=("parallel",)),
        cost_estimate=cost,
    )(x1, w1p, b1, w2p, b2)

    out = out_flat.reshape(N, H2, W2, Cout)
    return jnp.transpose(out, (0, 3, 1, 2))                # NHWC -> NCHW


# --------------------------------------------------------------------------
# Pure-JAX (XLA conv, f32) reference for correctness checking
# --------------------------------------------------------------------------
def _reference_forward(x_nchw, params):
    w1, b1, w2, b2 = params

    def conv(x, w_hwio, b):
        w_oihw = jnp.transpose(w_hwio, (3, 2, 0, 1))
        y = jax.lax.conv_general_dilated(
            x, w_oihw, window_strides=(2, 2), padding=((1, 1), (1, 1)),
            dimension_numbers=("NCHW", "OIHW", "NCHW"))
        return jnp.maximum(y + b[None, :, None, None], 0.0)

    return conv(conv(x_nchw, w1, b1), w2, b2)


if __name__ == "__main__":
    key = jax.random.PRNGKey(0)
    k1, k2, k3, k4, kx = jax.random.split(key, 5)

    N, Cin, H, W = 2, 3, 32, 32
    x = jax.random.normal(kx, (N, Cin, H, W), jnp.float32)

    # Deterministic parameter init (Kaiming-like scaling), HWIO layout.
    w1 = jax.random.normal(k1, (3, 3, 3, 64), jnp.float32) * (2.0 / (9 * 3)) ** 0.5
    b1 = jax.random.normal(k2, (64,), jnp.float32) * 0.01
    w2 = jax.random.normal(k3, (3, 3, 64, 64), jnp.float32) * (2.0 / (9 * 64)) ** 0.5
    b2 = jax.random.normal(k4, (64,), jnp.float32) * 0.01
    params = (w1, b1, w2, b2)

    prepared = prepare_params(params)          # one-time packing (bf16)
    out = jax.jit(downsampling_network_forward)(x, prepared)
    out = jax.block_until_ready(out)

    assert out.shape == (N, 64, H // 4, W // 4), out.shape
    expected = _reference_forward(x, params)
    # bf16 matmul inputs (f32 accumulation) -> loosened tolerance vs f32 ref.
    max_err = float(jnp.max(jnp.abs(out - expected)))
    assert jnp.allclose(out, expected, atol=5e-2, rtol=5e-2), max_err
    print("KERNEL_OK")
</pallas_src>

<mosaic_0001>
module attributes {stable_mosaic.version = 11 : i64} {
  func.func @_fused_down4x_kernel(%arg0: i32, %arg1: memref<1x4x8x8x48xbf16, #tpu.memory_space<vmem>>, %arg2: memref<48x64xbf16, #tpu.memory_space<vmem>>, %arg3: memref<1x64xf32, #tpu.memory_space<vmem>>, %arg4: memref<4x256x64xbf16, #tpu.memory_space<vmem>>, %arg5: memref<1x64xf32, #tpu.memory_space<vmem>>, %arg6: memref<1x64x64xf32, #tpu.memory_space<vmem>>, %arg7: memref<1x9x9x256xbf16, #tpu.memory_space<vmem>>) attributes {dimension_semantics = [#tpu.dimension_semantics<parallel>], iteration_bounds = array<i64: 2>, scalar_prefetch = 0 : i64, scratch_operands = 1 : i64, tpu.core_type = #tpu.core_type<tc>, window_params = [{transform_indices = @transform_0, window_bounds = array<i64: 1, 4, 8, 8, 48>}, {pipeline_mode = #tpu.pipeline_mode<synchronous>, transform_indices = @transform_1, window_bounds = array<i64: 48, 64>}, {pipeline_mode = #tpu.pipeline_mode<synchronous>, transform_indices = @transform_2, window_bounds = array<i64: 1, 64>}, {pipeline_mode = #tpu.pipeline_mode<synchronous>, transform_indices = @transform_3, window_bounds = array<i64: 4, 256, 64>}, {pipeline_mode = #tpu.pipeline_mode<synchronous>, transform_indices = @transform_4, window_bounds = array<i64: 1, 64>}, {transform_indices = @transform_5, window_bounds = array<i64: 1, 64, 64>}]} {
    %c0 = arith.constant 0 : index
    %c0_0 = arith.constant 0 : index
    %c0_1 = arith.constant 0 : index
    %c0_2 = arith.constant 0 : index
    %c0_3 = arith.constant 0 : index
    %0 = vector.load %arg1[%c0, %c0_0, %c0_1, %c0_2, %c0_3] : memref<1x4x8x8x48xbf16, #tpu.memory_space<vmem>>, vector<1x4x8x8x48xbf16>
    %1 = vector.shape_cast %0 : vector<1x4x8x8x48xbf16> to vector<256x48xbf16>
    %c0_4 = arith.constant 0 : index
    %c0_5 = arith.constant 0 : index
    %2 = vector.load %arg2[%c0_4, %c0_5] : memref<48x64xbf16, #tpu.memory_space<vmem>>, vector<48x64xbf16>
    %cst = arith.constant dense<0.000000e+00> : vector<256x64xf32>
    %3 = tpu.matmul %1, %2, %cst {dimension_numbers = #tpu.dot_dimension_numbers<[1], [0], [0], [1], [0, 0, 1, 1], [], []>} : vector<256x48xbf16>, vector<48x64xbf16>, vector<256x64xf32> -> vector<256x64xf32>
    %c0_6 = arith.constant 0 : index
    %c0_7 = arith.constant 0 : index
    %4 = vector.load %arg3[%c0_6, %c0_7] : memref<1x64xf32, #tpu.memory_space<vmem>>, vector<1x64xf32>
    %5 = vector.broadcast %4 : vector<1x64xf32> to vector<256x64xf32>
    %6 = arith.addf %3, %5 : vector<256x64xf32>
    %cst_8 = arith.constant 0.000000e+00 : f32
    %7 = vector.broadcast %cst_8 : f32 to vector<256x64xf32>
    %8 = arith.maximumf %6, %7 : vector<256x64xf32>
    %9 = arith.truncf %8 : vector<256x64xf32> to vector<256x64xbf16>
    %10 = vector.shape_cast %9 : vector<256x64xbf16> to vector<1x4x8x8x64xbf16>
    %cst_9 = arith.constant 0.000000e+00 : bf16
    %11 = vector.broadcast %cst_9 : bf16 to vector<1x9x9x256xbf16>
    %c0_10 = arith.constant 0 : index
    %c0_11 = arith.constant 0 : index
    %c0_12 = arith.constant 0 : index
    %c0_13 = arith.constant 0 : index
    %12 = vector.load %arg7[%c0_10, %c0_11, %c0_12, %c0_13] : memref<1x9x9x256xbf16, #tpu.memory_space<vmem>>, vector<1x9x9x256xbf16>
    tpu.vector_store %arg7[%c0_10, %c0_11, %c0_12, %c0_13], %11 {strides = array<i32>} : memref<1x9x9x256xbf16, #tpu.memory_space<vmem>>, vector<1x9x9x256xbf16>,
    %13 = vector.extract_strided_slice %10 {offsets = [0, 0, 0, 0, 0], sizes = [1, 1, 8, 8, 64], strides = [1, 1, 1, 1, 1]} : vector<1x4x8x8x64xbf16> to vector<1x1x8x8x64xbf16>
    %14 = vector.shape_cast %13 : vector<1x1x8x8x64xbf16> to vector<1x8x8x64xbf16>
    %c0_14 = arith.constant 0 : index
    %c0_15 = arith.constant 0 : index
    %c0_16 = arith.constant 0 : index
    %c192 = arith.constant 192 : index
    %15 = vector.load %arg7[%c0_14, %c0_15, %c0_16, %c192] : memref<1x9x9x256xbf16, #tpu.memory_space<vmem>>, vector<1x8x8x64xbf16>
    tpu.vector_store %arg7[%c0_14, %c0_15, %c0_16, %c192], %14 {strides = array<i32>} : memref<1x9x9x256xbf16, #tpu.memory_space<vmem>>, vector<1x8x8x64xbf16>,
    %16 = vector.extract_strided_slice %10 {offsets = [0, 1, 0, 0, 0], sizes = [1, 1, 8, 8, 64], strides = [1, 1, 1, 1, 1]} : vector<1x4x8x8x64xbf16> to vector<1x1x8x8x64xbf16>
    %17 = vector.shape_cast %16 : vector<1x1x8x8x64xbf16> to vector<1x8x8x64xbf16>
    %c0_17 = arith.constant 0 : index
    %c0_18 = arith.constant 0 : index
    %c1 = arith.constant 1 : index
    %c128 = arith.constant 128 : index
    %18 = vector.load %arg7[%c0_17, %c0_18, %c1, %c128] : memref<1x9x9x256xbf16, #tpu.memory_space<vmem>>, vector<1x8x8x64xbf16>
    tpu.vector_store %arg7[%c0_17, %c0_18, %c1, %c128], %17 {strides = array<i32>} : memref<1x9x9x256xbf16, #tpu.memory_space<vmem>>, vector<1x8x8x64xbf16>,
    %19 = vector.extract_strided_slice %10 {offsets = [0, 2, 0, 0, 0], sizes = [1, 1, 8, 8, 64], strides = [1, 1, 1, 1, 1]} : vector<1x4x8x8x64xbf16> to vector<1x1x8x8x64xbf16>
    %20 = vector.shape_cast %19 : vector<1x1x8x8x64xbf16> to vector<1x8x8x64xbf16>
    %c0_19 = arith.constant 0 : index
    %c1_20 = arith.constant 1 : index
    %c0_21 = arith.constant 0 : index
    %c64 = arith.constant 64 : index
    %21 = vector.load %arg7[%c0_19, %c1_20, %c0_21, %c64] : memref<1x9x9x256xbf16, #tpu.memory_space<vmem>>, vector<1x8x8x64xbf16>
    tpu.vector_store %arg7[%c0_19, %c1_20, %c0_21, %c64], %20 {strides = array<i32>} : memref<1x9x9x256xbf16, #tpu.memory_space<vmem>>, vector<1x8x8x64xbf16>,
    %22 = vector.extract_strided_slice %10 {offsets = [0, 3, 0, 0, 0], sizes = [1, 1, 8, 8, 64], strides = [1, 1, 1, 1, 1]} : vector<1x4x8x8x64xbf16> to vector<1x1x8x8x64xbf16>
    %23 = vector.shape_cast %22 : vector<1x1x8x8x64xbf16> to vector<1x8x8x64xbf16>
    %c0_22 = arith.constant 0 : index
    %c1_23 = arith.constant 1 : index
    %c1_24 = arith.constant 1 : index
    %c0_25 = arith.constant 0 : index
    %24 = vector.load %arg7[%c0_22, %c1_23, %c1_24, %c0_25] : memref<1x9x9x256xbf16, #tpu.memory_space<vmem>>, vector<1x8x8x64xbf16>
    tpu.vector_store %arg7[%c0_22, %c1_23, %c1_24, %c0_25], %23 {strides = array<i32>} : memref<1x9x9x256xbf16, #tpu.memory_space<vmem>>, vector<1x8x8x64xbf16>,
    %cst_26 = arith.constant 0.000000e+00 : f32
    %25 = vector.broadcast %cst_26 : f32 to vector<64x64xf32>
    %c0_27 = arith.constant 0 : index
    %c0_28 = arith.constant 0 : index
    %c0_29 = arith.constant 0 : index
    %c0_30 = arith.constant 0 : index
    %26 = vector.load %arg7[%c0_27, %c0_28, %c0_29, %c0_30] : memref<1x9x9x256xbf16, #tpu.memory_space<vmem>>, vector<1x8x8x256xbf16>
    %27 = vector.shape_cast %26 : vector<1x8x8x256xbf16> to vector<64x256xbf16>
    %c0_31 = arith.constant 0 : index
    %c0_32 = arith.constant 0 : index
    %c0_33 = arith.constant 0 : index
    %28 = vector.load %arg4[%c0_31, %c0_32, %c0_33] : memref<4x256x64xbf16, #tpu.memory_space<vmem>>, vector<1x256x64xbf16>
    %29 = vector.shape_cast %28 : vector<1x256x64xbf16> to vector<256x64xbf16>
    %cst_34 = arith.constant dense<0.000000e+00> : vector<64x64xf32>
    %30 = tpu.matmul %27, %29, %cst_34 {dimension_numbers = #tpu.dot_dimension_numbers<[1], [0], [0], [1], [0, 0, 1, 1], [], []>} : vector<64x256xbf16>, vector<256x64xbf16>, vector<64x64xf32> -> vector<64x64xf32>
    %31 = arith.addf %25, %30 : vector<64x64xf32>
    %c0_35 = arith.constant 0 : index
    %c0_36 = arith.constant 0 : index
    %c1_37 = arith.constant 1 : index
    %c0_38 = arith.constant 0 : index
    %32 = vector.load %arg7[%c0_35, %c0_36, %c1_37, %c0_38] : memref<1x9x9x256xbf16, #tpu.memory_space<vmem>>, vector<1x8x8x256xbf16>
    %33 = vector.shape_cast %32 : vector<1x8x8x256xbf16> to vector<64x256xbf16>
    %c1_39 = arith.constant 1 : index
    %c0_40 = arith.constant 0 : index
    %c0_41 = arith.constant 0 : index
    %34 = vector.load %arg4[%c1_39, %c0_40, %c0_41] : memref<4x256x64xbf16, #tpu.memory_space<vmem>>, vector<1x256x64xbf16>
    %35 = vector.shape_cast %34 : vector<1x256x64xbf16> to vector<256x64xbf16>
    %cst_42 = arith.constant dense<0.000000e+00> : vector<64x64xf32>
    %36 = tpu.matmul %33, %35, %cst_42 {dimension_numbers = #tpu.dot_dimension_numbers<[1], [0], [0], [1], [0, 0, 1, 1], [], []>} : vector<64x256xbf16>, vector<256x64xbf16>, vector<64x64xf32> -> vector<64x64xf32>
    %37 = arith.addf %31, %36 : vector<64x64xf32>
    %c0_43 = arith.constant 0 : index
    %c1_44 = arith.constant 1 : index
    %c0_45 = arith.constant 0 : index
    %c0_46 = arith.constant 0 : index
    %38 = vector.load %arg7[%c0_43, %c1_44, %c0_45, %c0_46] : memref<1x9x9x256xbf16, #tpu.memory_space<vmem>>, vector<1x8x8x256xbf16>
    %39 = vector.shape_cast %38 : vector<1x8x8x256xbf16> to vector<64x256xbf16>
    %c2 = arith.constant 2 : index
    %c0_47 = arith.constant 0 : index
    %c0_48 = arith.constant 0 : index
    %40 = vector.load %arg4[%c2, %c0_47, %c0_48] : memref<4x256x64xbf16, #tpu.memory_space<vmem>>, vector<1x256x64xbf16>
    %41 = vector.shape_cast %40 : vector<1x256x64xbf16> to vector<256x64xbf16>
    %cst_49 = arith.constant dense<0.000000e+00> : vector<64x64xf32>
    %42 = tpu.matmul %39, %41, %cst_49 {dimension_numbers = #tpu.dot_dimension_numbers<[1], [0], [0], [1], [0, 0, 1, 1], [], []>} : vector<64x256xbf16>, vector<256x64xbf16>, vector<64x64xf32> -> vector<64x64xf32>
    %43 = arith.addf %37, %42 : vector<64x64xf32>
    %c0_50 = arith.constant 0 : index
    %c1_51 = arith.constant 1 : index
    %c1_52 = arith.constant 1 : index
    %c0_53 = arith.constant 0 : index
    %44 = vector.load %arg7[%c0_50, %c1_51, %c1_52, %c0_53] : memref<1x9x9x256xbf16, #tpu.memory_space<vmem>>, vector<1x8x8x256xbf16>
    %45 = vector.shape_cast %44 : vector<1x8x8x256xbf16> to vector<64x256xbf16>
    %c3 = arith.constant 3 : index
    %c0_54 = arith.constant 0 : index
    %c0_55 = arith.constant 0 : index
    %46 = vector.load %arg4[%c3, %c0_54, %c0_55] : memref<4x256x64xbf16, #tpu.memory_space<vmem>>, vector<1x256x64xbf16>
    %47 = vector.shape_cast %46 : vector<1x256x64xbf16> to vector<256x64xbf16>
    %cst_56 = arith.constant dense<0.000000e+00> : vector<64x64xf32>
    %48 = tpu.matmul %45, %47, %cst_56 {dimension_numbers = #tpu.dot_dimension_numbers<[1], [0], [0], [1], [0, 0, 1, 1], [], []>} : vector<64x256xbf16>, vector<256x64xbf16>, vector<64x64xf32> -> vector<64x64xf32>
    %49 = arith.addf %43, %48 : vector<64x64xf32>
    %c0_57 = arith.constant 0 : index
    %c0_58 = arith.constant 0 : index
    %50 = vector.load %arg5[%c0_57, %c0_58] : memref<1x64xf32, #tpu.memory_space<vmem>>, vector<1x64xf32>
    %51 = vector.broadcast %50 : vector<1x64xf32> to vector<64x64xf32>
    %52 = arith.addf %49, %51 : vector<64x64xf32>
    %cst_59 = arith.constant 0.000000e+00 : f32
    %53 = vector.broadcast %cst_59 : f32 to vector<64x64xf32>
    %54 = arith.maximumf %52, %53 : vector<64x64xf32>
    %55 = vector.shape_cast %54 : vector<64x64xf32> to vector<1x64x64xf32>
    %c0_60 = arith.constant 0 : index
    %c0_61 = arith.constant 0 : index
    %c0_62 = arith.constant 0 : index
    %56 = vector.load %arg6[%c0_60, %c0_61, %c0_62] : memref<1x64x64xf32, #tpu.memory_space<vmem>>, vector<1x64x64xf32>
    tpu.vector_store %arg6[%c0_60, %c0_61, %c0_62], %55 {strides = array<i32>} : memref<1x64x64xf32, #tpu.memory_space<vmem>>, vector<1x64x64xf32>,
    return
  }
  func.func @transform_0(%arg0: i32) -> (i32, i32, i32, i32, i32) {
    %c0_i32 = arith.constant 0 : i32
    %c0_i32_0 = arith.constant 0 : i32
    %c0_i32_1 = arith.constant 0 : i32
    %c0_i32_2 = arith.constant 0 : i32
    %c0_i32_3 = arith.constant 0 : i32
    return %arg0, %c0_i32, %c0_i32_0, %c0_i32_1, %c0_i32_2 : i32, i32, i32, i32, i32
  }
  func.func @transform_1(%arg0: i32) -> (i32, i32) {
    %c0_i32 = arith.constant 0 : i32
    %c0_i32_0 = arith.constant 0 : i32
    %c0_i32_1 = arith.constant 0 : i32
    return %c0_i32, %c0_i32_0 : i32, i32
  }
  func.func @transform_2(%arg0: i32) -> (i32, i32) {
    %c0_i32 = arith.constant 0 : i32
    %c0_i32_0 = arith.constant 0 : i32
    %c0_i32_1 = arith.constant 0 : i32
    return %c0_i32, %c0_i32_0 : i32, i32
  }
  func.func @transform_3(%arg0: i32) -> (i32, i32, i32) {
    %c0_i32 = arith.constant 0 : i32
    %c0_i32_0 = arith.constant 0 : i32
    %c0_i32_1 = arith.constant 0 : i32
    %c0_i32_2 = arith.constant 0 : i32
    return %c0_i32, %c0_i32_0, %c0_i32_1 : i32, i32, i32
  }
  func.func @transform_4(%arg0: i32) -> (i32, i32) {
    %c0_i32 = arith.constant 0 : i32
    %c0_i32_0 = arith.constant 0 : i32
    %c0_i32_1 = arith.constant 0 : i32
    return %c0_i32, %c0_i32_0 : i32, i32
  }
  func.func @transform_5(%arg0: i32) -> (i32, i32, i32) {
    %c0_i32 = arith.constant 0 : i32
    %c0_i32_0 = arith.constant 0 : i32
    %c0_i32_1 = arith.constant 0 : i32
    return %arg0, %c0_i32, %c0_i32_0 : i32, i32, i32
  }
}

</mosaic_0001>

<bundles_post_ra>
// kernel: downsampling_network_forward.1
= control target key start
LH: loop header
LB: loop body
LE: loop exit
PB: predicated region body
PF: predicated region fallthrough
CT: control target
= control target key end

     0   :  { %10 = vsyncpa [#allocation4], 0  ;;  %s3994_s0 = inlined_call_operand.vmem [shape: bf16[2,4,8,8,48], index: 0, kind: input, shape index: {}]   ;;  %s3995_s1 = inlined_call_operand.vmem [shape: bf16[48,64], index: 1, kind: input, shape index: {}]   ;;  %s3996_s2 = inlined_call_operand.vmem [shape: f32[1,64], index: 2, kind: input, shape index: {}]   ;;  %s3997_s3 = inlined_call_operand.vmem [shape: bf16[4,256,64], index: 3, kind: input, shape index: {}]   ;;  %s3998_s4 = inlined_call_operand.vmem [shape: f32[1,64], index: 4, kind: input, shape index: {}]   ;;  %s3999_s5 = inlined_call_operand.hbm [shape: f32[2,64,64], index: 5, kind: output, shape index: {}]  }
   0x1   :  { %12 = vsyncpa [#allocation4 + $0x1], 0  ;;  %s3166_s18 = smov 0   ;;  %s3168_s19 = smov 0  }
   0x2   :  { %s3170_s20 = smov 0   ;;  %s3172_s21 = smov 0  }
   0x3 LB: > { %s3187_s22 = sadd.s32 4294967295, %s3129_s21   ;;  %s2385_s23 = sadd.s32 4294967294, %s3129_s21   ;;  %s3129_s21 = sphi %s3172_s21, %s4013_s21   ;;  %s3125_s20 = sphi %s3170_s20, %s4012_s20   ;;  %s3121_s19 = sphi %s3168_s19, %s4011_s19   ;;  %s3117_s18 = sphi %s3166_s18, %s4010_s18  }
   0x4   : > { %s3191_s24 = sadd.s32 1, %s3129_s21   ;;  %s135_s25 = sadd.s32 1, %s3125_s20 }
   0x5   : > { %s132_s26 = ssub.s32 %s3129_s21, %s3191_s24  ;;  %p145_p0 = scmp.ne.s32.totalorder %s3125_s20, %s3121_s19 }
   0x6   : > { %p133_p1 = scmp.eq.s32.totalorder %s132_s26, 0  ;;  %p146_p2 = scmp.eq.s32.totalorder %s3187_s22, 1 }
   0x7   : > { %p151_p3 = scmp.ne.s32.totalorder %s3121_s19, %s3117_s18  ;;  %p152_p4 = scmp.eq.s32.totalorder %s2385_s23, 1 }
   0x8   : > { %s3202_s27 = scalar_select %p133_p1, %s3125_s20, %s135_s25  }
   0x9   : > { %p3204_p5 = por %p146_p2, %p145_p0  ;;  %p3208_p6 = por %p152_p4, %p151_p3 }
   0xa   : > { %p2388_p7 = scmp.ge.s32.totalorder %s3129_s21, 1  ;;  %p190_p8 = scmp.lt.s32.totalorder %s3129_s21, 3 }
   0xc   : > { %p191_p9 = pnand %p2388_p7, %p190_p8 }
   0xd   : > { %v2968_v0 = vld [vmem:[%s3995_s1] sm:$0xff] (!%p191_p9)   ;;  %p218_p10 = scmp.lt.s32.totalorder (!%p191_p9), %s3187_s22, 1  ;;  %v2969_v1 = vld [vmem:[%s3995_s1 + $0x8] sm:$0xff] (!%p191_p9)   ;;  %vm367_vm0 = vcmask (!%p191_p9), 392192   ;;  %v2970_v2 = vld [vmem:[%s3995_s1 + $0x10] sm:$0xff] (!%p191_p9)   ;;  %vm706_vm1 = vcmask (!%p191_p9), 1040384  }
   0xe   : > { %194 = sbr.rel (%p191_p9) target bundleno = 742 (0x2e6), region = 40  ;;  %2871 = vmatprep.subr.bf16.mxu0 (!%p191_p9), %v2968_v0  ;;  %vm707_vm2 = vsmask.f32 (!%p191_p9), 256  ;;  %vm709_vm3 = vcmask (!%p191_p9), 1044484   ;;  %vm710_vm4 = vsmask.f32 (!%p191_p9), 4352 }
   0xf   : > { %2872 = vmatpush3.bf16.msra.mxu0 (!%p191_p9), %v2968_v0  ;;  %vm708_vm5 = vmand (!%p191_p9), %vm706_vm1, %vm707_vm2  ;;  %v721_v19 = vld [vmem:[#allocation2 + $0x28] sm:$0x11] (!%p191_p9)  ;;  %v725_v24 = vld [vmem:[#allocation2 + $0x38] sm:$0x11] (!%p191_p9)  ;;  %v3131_v38 = vmov (!%p191_p9), 0   ;;  %s3132_s23 = smov (!%p191_p9), 64  }
  0x10   : > { %2873 = vmatprep.subr.bf16.mxu0 (!%p191_p9), %v2969_v1  ;;  %vm711_vm6 = vmand (!%p191_p9), %vm709_vm3, %vm710_vm4  ;;  %v713_v21 = vld [vmem:[#allocation2 + $0x8] sm:$0x11] (!%p191_p9)  ;;  %v717_v26 = vld [vmem:[#allocation2 + $0x18] sm:$0x11] (!%p191_p9)  ;;  %705 = vst [vmem:[#allocation2] sm:$0xff] (!%p191_p9), %v3131_v38  ;;  %vm867_vm8 = vcmask (!%p191_p9), 516096  }
  0x11   : > { %vm3263_vm7 = vmor (!%p191_p9), %vm711_vm6, %vm708_vm5  ;;  %v737_v28 = vld [vmem:[#allocation2 + $0x68] sm:$0x11] (!%p191_p9)  ;;  %v741_v32 = vld [vmem:[#allocation2 + $0x78] sm:$0x11] (!%p191_p9)  ;;  %716 = vst [vmem:[#allocation2 + $0x10] sm:$0xff] (!%p191_p9), %v3131_v38  ;;  %vm772_vm10 = vcmask (!%p191_p9), 1043968  }
  0x12   : > { %v722_v22 = vsel (!%p191_p9), %vm3263_vm7, 0, %v721_v19  ;;  %v714_v23 = vsel (!%p191_p9), %vm3263_vm7, 0, %v713_v21  ;;  %v726_v25 = vsel (!%p191_p9), %vm3263_vm7, 0, %v725_v24  ;;  %v718_v27 = vsel (!%p191_p9), %vm3263_vm7, 0, %v717_v26  ;;  %v729_v30 = vld [vmem:[#allocation2 + $0x48] sm:$0x11] (!%p191_p9)  ;;  %vm3324_vm9 = vmand (!%p191_p9), %vm867_vm8, %vm707_vm2 }
  0x13   : > { %2874 = vmatpush3.bf16.msra.mxu0 (!%p191_p9), %v2969_v1  ;;  %723 = vst [vmem:[#allocation2 + $0x28] sm:$0x11] (!%p191_p9), %v722_v22  ;;  %715 = vst [vmem:[#allocation2 + $0x8] sm:$0x11] (!%p191_p9), %v714_v23  ;;  %v738_v29 = vsel (!%p191_p9), %vm3263_vm7, 0, %v737_v28  ;;  %v730_v31 = vsel (!%p191_p9), %vm3263_vm7, 0, %v729_v30 }
  0x14   : > { %2875 = vmatprep.subr.bf16.mxu0 (!%p191_p9), %v2970_v2  ;;  %727 = vst [vmem:[#allocation2 + $0x38] sm:$0x11] (!%p191_p9), %v726_v25  ;;  %719 = vst [vmem:[#allocation2 + $0x18] sm:$0x11] (!%p191_p9), %v718_v27  ;;  %v742_v33 = vsel (!%p191_p9), %vm3263_vm7, 0, %v741_v32  ;;  %v2987_v56 = vld [vmem:[%s3997_s3 + $0xc0] sm:$0xff] (!%p191_p9)  }
  0x15   : > { %s219_s9 = scalar_select %p218_p10, %s3187_s22, 1  ;;  %739 = vst [vmem:[#allocation2 + $0x68] sm:$0x11] %v738_v29  ;;  %731 = vst [vmem:[#allocation2 + $0x48] sm:$0x11] %v730_v31  ;;  %v2988_v57 = vld [vmem:[%s3997_s3 + $0x140] sm:$0xff]   ;;  %2711 = vmatprep.subr.bf16.mxu1 %v2987_v56 }
  0x16   : > { %v733_v34 = vld [vmem:[#allocation2 + $0x58] sm:$0x11]  ;;  %743 = vst [vmem:[#allocation2 + $0x78] sm:$0x11] %v742_v33  ;;  %v745_v36 = vld [vmem:[#allocation2 + $0x88] sm:$0x11] }
  0x17   : > { %s2658_s12 = sshll.u32 %s219_s9, 7  ;;  %2876 = vmatpush3.bf16.msra.mxu0 %v2970_v2  ;;  %v734_v35 = vsel %vm3263_vm7, 0, %v733_v34  ;;  %v746_v37 = vsel %vm3263_vm7, 0, %v745_v36  ;;  %720 = vst [vmem:[#allocation2 + $0x20] sm:$0xff] %v3131_v38  ;;  %724 = vst [vmem:[#allocation2 + $0x30] sm:$0xff] %v3131_v38  ;;  %v2989_v58 = vld [vmem:[%s3997_s3 + $0x80] sm:$0xff]  }
  0x18   : > { %s3228_s15 = scalar_lea.vmem %s3994_s0, %s2658_s12  ;;  %735 = vst [vmem:[#allocation2 + $0x58] sm:$0x11] %v734_v35  ;;  %747 = vst [vmem:[#allocation2 + $0x88] sm:$0x11] %v746_v37  ;;  %v3288_v39 = vld [vmem:[%s3996_s2] ss:$0 sm:$0xff]  ;;  %2791 = vmatprep.subr.bf16.mxu0 %v2988_v57  ;;  %2712 = vmatpush3.bf16.msra.mxu1 %v2989_v58 }
  0x19   : > { %v2971_v3 = vld [vmem:[%s3228_s15] sm:$0xff]   ;;  %v2972_v4 = vld [vmem:[%s3228_s15 + $0x8] sm:$0xff]   ;;  %v2973_v5 = vld [vmem:[%s3228_s15 + $0x10] sm:$0xff]   ;;  %728 = vst [vmem:[#allocation2 + $0x40] sm:$0xff] %v3131_v38  ;;  %vm861_vm11 = vcmask 519168   ;;  %s215_s7 = sand.u32 1, %s3121_s19  }
  0x1a   : > { %2877 = vmatprep.mubr.msk.bf16.mxu0 %vm367_vm0, %v2971_v3  ;;  %v2974_v6 = vld [vmem:[%s3228_s15 + $0x18] sm:$0xff]   ;;  %v2975_v7 = vld [vmem:[%s3228_s15 + $0x20] sm:$0xff]   ;;  %v2976_v8 = vld [vmem:[%s3228_s15 + $0x28] sm:$0xff]   ;;  %732 = vst [vmem:[#allocation2 + $0x50] sm:$0xff] %v3131_v38  ;;  %vm862_vm12 = vsmask.f32 7938 }
  0x1b   : > { %2878 = vmatmul.mubr.msk.bf16.vlgmr.msra.gmra.mrb[0].mxu0 %vm367_vm0, %v2972_v4  ;;  %v2977_v9 = vld [vmem:[%s3228_s15 + $0x30] sm:$0xff]   ;;  %v2978_v10 = vld [vmem:[%s3228_s15 + $0x38] sm:$0xff]   ;;  %v2979_v11 = vld [vmem:[%s3228_s15 + $0x40] sm:$0xff]   ;;  %736 = vst [vmem:[#allocation2 + $0x60] sm:$0xff] %v3131_v38  ;;  %vm1123_vm14 = vsmask.f32 3328 }
  0x1c   : > { %2881 = vmatprep.mubr.msk.bf16.mxu0 %vm367_vm0, %v2973_v5  ;;  %v2980_v12 = vld [vmem:[%s3228_s15 + $0x48] sm:$0xff]   ;;  %v2981_v13 = vld [vmem:[%s3228_s15 + $0x50] sm:$0xff]   ;;  %v2982_v14 = vld [vmem:[%s3228_s15 + $0x58] sm:$0xff]   ;;  %740 = vst [vmem:[#allocation2 + $0x70] sm:$0xff] %v3131_v38  ;;  %vm1124_vm15 = vsmask.f32 7440 }
  0x1d   : > { %v2983_v15 = vld [vmem:[%s3228_s15 + $0x60] sm:$0xff]   ;;  %v2984_v16 = vld [vmem:[%s3228_s15 + $0x68] sm:$0xff]   ;;  %v2985_v17 = vld [vmem:[%s3228_s15 + $0x70] sm:$0xff]   ;;  %744 = vst [vmem:[#allocation2 + $0x80] sm:$0xff] %v3131_v38  ;;  %s2389_s10 = sshll.u32 %s215_s7, 6  ;;  %vm2300_vm1 = vcmask 523264  }
  0x1e   : > { %v2986_v18 = vld [vmem:[%s3228_s15 + $0x78] sm:$0xff]   ;;  %v2990_v59 = vld [vmem:[%s3997_s3 + $0x100] sm:$0xff]   ;;  %v881_v24 = vld [vmem:[#allocation2 + $0x2c] sm:$0x1]  ;;  %s2691_s11 = sshll.u32 %s3187_s22, 10  ;;  %s3953_s22 = scalar_lea.sflag [#allocation4], %s215_s7 }
  0x1f   : > { %2792 = vmatpush3.bf16.msra.mxu0 %v2990_v59  ;;  %v869_v32 = vld [vmem:[#allocation2 + $0xc] sm:$0x1]  ;;  %v887_v38 = vld [vmem:[#allocation2 + $0x3c] sm:$0x1]  ;;  %vm3544_vm13 = vmand %vm861_vm11, %vm862_vm12  ;;  %s3943_s15 = scalar_lea.hbm %s3999_s5, %s2691_s11  ;;  %s3133_s17 = smov [#allocation3]  }
  0x20   : > { %v2991_v57 = vld [vmem:[%s3997_s3 + $0xc8] sm:$0xff]   ;;  %s3071_s25 = sshll.u32 %s3133_s17, 4  ;;  %s3072_s25 = int_to_ptr.vmem [resolvable:$false] %s3071_s25 }
  0x21   : > { %v2994_v58 = vld [vmem:[%s3997_s3 + $0x108] sm:$0xff]   ;;  %2713 = vmatprep.subr.bf16.mxu1 %v2991_v57  ;;  %s3073_s26 = scalar_lea.vmem %s3072_s25, 2048 }
  0x23   : > { %2882 = vmatmul.mubr.msk.bf16.gmra.mrb[4].mxu0 %vm367_vm0, %v2974_v6 }
  0x24   : > { %2885 = vmatprep.mubr.msk.bf16.mxu0 %vm367_vm0, %v2975_v7 }
  0x2b   : > { %2886 = vmatmul.mubr.msk.bf16.gmra.mrb[8].mxu0 %vm367_vm0, %v2976_v8 }
  0x2c   : > { %2889 = vmatprep.mubr.msk.bf16.mxu0 %vm367_vm0, %v2977_v9 }
  0x33   : > { %2890 = vmatmul.mubr.msk.bf16.gmra.mrb[12].mxu0 %vm367_vm0, %v2978_v10 }
  0x34   : > { %2893 = vmatprep.mubr.msk.bf16.mxu0 %vm367_vm0, %v2979_v11 }
  0x3b   : > { %2894 = vmatmul.mubr.msk.bf16.gmra.mrb[16].mxu0 %vm367_vm0, %v2980_v12 }
  0x3c   : > { %2897 = vmatprep.mubr.msk.bf16.mxu0 %vm367_vm0, %v2981_v13 }
  0x43   : > { %2898 = vmatmul.mubr.msk.bf16.gmra.mrb[20].mxu0 %vm367_vm0, %v2982_v14 }
  0x44   : > { %2901 = vmatprep.mubr.msk.bf16.mxu0 %vm367_vm0, %v2983_v15 }
  0x4b   : > { %2902 = vmatmul.mubr.msk.bf16.gmra.mrb[24].mxu0 %vm367_vm0, %v2984_v16 }
  0x4c   : > { %2905 = vmatprep.mubr.msk.bf16.mxu0 %vm367_vm0, %v2985_v17 }
  0x53   : > { %2906 = vmatmul.mubr.msk.bf16.gmra.mrb[28].mxu0 %vm367_vm0, %v2986_v18  ;;  %vm3606_vm0 = vmor %vm1123_vm14, %vm1124_vm15 }
  0xee   : > { %v3290_v40 = vpop.f32.mrb[0].mxu0 }
  0xef   : > { %v450_v41 = vpop.f32.mrb[1].mxu0  ;;  %v3352_v59 = vadd.f32 %v3290_v40, %v3288_v39 }
  0xf0   : > { %v451_v42 = vadd.f32 %v3288_v39, %v450_v41  ;;  %v2880_v43 = vpop.f32.mrb[2].mxu0 }
  0xf1   : > { %v453_v44 = vpop.f32.mrb[3].mxu0  ;;  %v462_v47 = vadd.f32 %v2880_v43, %v3288_v39 }
  0xf2   : > { %v577_v45 = vmax.f32 %v451_v42, 0.0  ;;  %v454_v46 = vadd.f32 %v3288_v39, %v453_v44 }
  0xf3   : > { %v580_v52 = vmax.f32 %v462_v47, 0.0 }
  0xf4   : > { %v578_v48 = vmax.f32 %v454_v46, 0.0  ;;  %v2659_v49 = vpack.c.bf16 %v577_v45, %v577_v45  ;;  %v875_v46 = vld [vmem:[#allocation2 + $0x1c] sm:$0x1] }
  0xf5   : > { %v2662_v60 = vpack.c.bf16 %v580_v52, %v580_v52 }
  0xf6   : > { %v3295_v50 = vpop.f32.mrb[4].mxu0  ;;  %748 = vrot.lane.b32.xlu0 %v2659_v49, %s3132_s23  ;;  %v2660_v53 = vpack.c.bf16 %v578_v48, %v578_v48  ;;  %v2992_v48 = vld [vmem:[%s3997_s3 + $0x148] sm:$0xff]  }
  0xf7   : > { %v3298_v51 = vpop.f32.mrb[5].mxu0  ;;  %2793 = vmatprep.subr.bf16.mxu0 %v2992_v48  ;;  %v3001_v48 = vld [vmem:[%s3997_s3 + $0x98] sm:$0xff]  }
  0xf8   : > { %v3300_v54 = vpop.f32.mrb[6].mxu0  ;;  %2794 = vmatpush3.bf16.msra.mxu0 %v2994_v58 }
  0xf9   : > { %v3302_v55 = vpop.f32.mrb[7].mxu0 }
  0xfa   : > { %750 = vrot.lane.b32.xlu0 %v2660_v53, %s3132_s23 }
  0xfe   : > { %v2887_v61 = vpop.f32.mrb[8].mxu0  ;;  %754 = vrot.lane.b32.xlu0 %v2662_v60, %s3132_s23 }
  0xff   : > { %v491_v62 = vadd.f32 %v2887_v61, %v3288_v39  ;;  %v482_v63 = vpop.f32.mrb[9].mxu0 }
 0x100   : > { %v483_v0 = vadd.f32 %v3288_v39, %v482_v63  ;;  %v2888_v1 = vpop.f32.mrb[10].mxu0  ;;  %v2993_v63 = vld [vmem:[%s3997_s3 + $0x88] sm:$0xff]  }
 0x101   : > { %v587_v2 = vmax.f32 %v491_v62, 0.0  ;;  %v494_v3 = vadd.f32 %v2888_v1, %v3288_v39  ;;  %v485_v4 = vpop.f32.mrb[11].mxu0  ;;  %v905_v1 = vld [vmem:[#allocation2 + $0x6c] sm:$0x1]  ;;  %2714 = vmatpush3.bf16.msra.mxu1 %v2993_v63  ;;  %v3004_v63 = vld [vmem:[%s3997_s3 + $0x160] sm:$0xff]  }
 0x102   : > { %v585_v5 = vmax.f32 %v483_v0, 0.0  ;;  %v486_v6 = vadd.f32 %v3288_v39, %v485_v4  ;;  %v3362_v0 = vadd.f32 %v3288_v39, %v3302_v55  ;;  %v2996_v55 = vld [vmem:[%s3997_s3 + $0x150] sm:$0xff]  }
 0x103   : > { %v2669_v7 = vpack.c.bf16 %v587_v2, %v587_v2  ;;  %v588_v8 = vmax.f32 %v494_v3, 0.0  ;;  %2795 = vmatprep.subr.bf16.mxu0 %v2996_v55  ;;  %v3005_v55 = vld [vmem:[%s3997_s3 + $0xa0] sm:$0xff]  }
 0x104   : > { %v2667_v9 = vpack.c.bf16 %v585_v5, %v585_v5  ;;  %v586_v10 = vmax.f32 %v486_v6, 0.0 }
 0x105   : > { %v798_v11 = vshrl.u32 %v2669_v7, 16  ;;  %v2670_v12 = vpack.c.bf16 %v588_v8, %v588_v8  ;;  %v801_v13 = vshll.u32 %v2669_v7, 16 }
 0x106   : > { %v782_v14 = vshrl.u32 %v2667_v9, 16  ;;  %v785_v15 = vshll.u32 %v2667_v9, 16  ;;  %v2668_v16 = vpack.c.bf16 %v586_v10, %v586_v10  ;;  %v2891_v17 = vpop.f32.mrb[12].mxu0 }
 0x107   : > { %v800_v18 = vrot.slane %v798_v11, 7  ;;  %v806_v19 = vshrl.u32 %v2670_v12, 16  ;;  %v809_v20 = vshll.u32 %v2670_v12, 16  ;;  %v507_v21 = vadd.f32 %v2891_v17, %v3288_v39  ;;  %v498_v22 = vpop.f32.mrb[13].mxu0 }
 0x108   : > { %v784_v25 = vrot.slane %v782_v14, 7  ;;  %v790_v26 = vshrl.u32 %v2668_v16, 16  ;;  %v793_v27 = vshll.u32 %v2668_v16, 16  ;;  %v499_v28 = vadd.f32 %v3288_v39, %v498_v22  ;;  %v2892_v29 = vpop.f32.mrb[14].mxu0  ;;  %v2998_v16 = vld [vmem:[%s3997_s3 + $0x110] sm:$0xff]  }
 0x109   : > { %v3329_v30 = vor.u32 %v801_v13, %v800_v18  ;;  %v804_v31 = vrot.slane %v800_v18, 4  ;;  %v808_v33 = vrot.slane %v806_v19, 7  ;;  %v591_v34 = vmax.f32 %v507_v21, 0.0  ;;  %v501_v35 = vpop.f32.mrb[15].mxu0  ;;  %v893_v19 = vld [vmem:[#allocation2 + $0x4c] sm:$0x1]  ;;  %2796 = vmatpush3.bf16.msra.mxu0 %v2998_v16 }
 0x10a   : > { %v3331_v36 = vor.u32 %v785_v15, %v784_v25  ;;  %v788_v37 = vrot.slane %v784_v25, 4  ;;  %v792_v41 = vrot.slane %v790_v26, 7  ;;  %v589_v42 = vmax.f32 %v499_v28, 0.0  ;;  %v2995_v15 = vld [vmem:[%s3997_s3 + $0xd0] sm:$0xff]  }
 0x10b   : > { %v882_v43 = vsel %vm3324_vm9, %v804_v31, %v881_v24  ;;  %v3335_v44 = vor.u32 %v809_v20, %v808_v33  ;;  %v812_v45 = vrot.slane %v808_v33, 4  ;;  %v2673_v47 = vpack.c.bf16 %v591_v34, %v591_v34  ;;  %v2997_v24 = vld [vmem:[%s3997_s3 + $0x90] sm:$0xff]   ;;  %2715 = vmatprep.subr.bf16.mxu1 %v2995_v15  ;;  %v3000_v34 = vld [vmem:[%s3997_s3 + $0x158] sm:$0xff]  }
 0x10c   : > { %883 = vst [vmem:[#allocation2 + $0x2c] sm:$0x1] %v882_v43  ;;  %v870_v49 = vsel %vm3324_vm9, %v788_v37, %v869_v32  ;;  %v3342_v52 = vor.u32 %v793_v27, %v792_v41  ;;  %v796_v53 = vrot.slane %v792_v41, 4  ;;  %v2671_v56 = vpack.c.bf16 %v589_v42, %v589_v42  ;;  %2716 = vmatpush3.bf16.msra.mxu1 %v2997_v24  ;;  %v2999_v41 = vld [vmem:[%s3997_s3 + $0xd8] sm:$0xff]  }
 0x10d   : > { %871 = vst [vmem:[#allocation2 + $0xc] sm:$0x1] %v870_v49  ;;  %v888_v60 = vsel %vm3324_vm9, %v812_v45, %v887_v38  ;;  %v830_v61 = vshrl.u32 %v2673_v47, 16  ;;  %v510_v62 = vadd.f32 %v2892_v29, %v3288_v39  ;;  %v502_v3 = vadd.f32 %v3288_v39, %v501_v35  ;;  %v3002_v42 = vld [vmem:[%s3997_s3 + $0x118] sm:$0xff]   ;;  %2797 = vmatprep.subr.bf16.mxu0 %v3000_v34 }
 0x10e   : > { %889 = vst [vmem:[#allocation2 + $0x3c] sm:$0x1] %v888_v60  ;;  %v876_v40 = vsel %vm3324_vm9, %v796_v53, %v875_v46  ;;  %v814_v2 = vshrl.u32 %v2671_v56, 16  ;;  %v2895_v4 = vpop.f32.mrb[16].mxu0  ;;  %v833_v6 = vshll.u32 %v2673_v47, 16  ;;  %v817_v11 = vshll.u32 %v2671_v56, 16  ;;  %2717 = vmatprep.subr.bf16.mxu1 %v2999_v41  ;;  %2798 = vmatpush3.bf16.msra.mxu0 %v3002_v42 }
 0x10f   : > { %877 = vst [vmem:[#allocation2 + $0x1c] sm:$0x1] %v876_v40  ;;  %v832_v5 = vrot.slane %v830_v61, 7  ;;  %v592_v7 = vmax.f32 %v510_v62, 0.0  ;;  %v523_v8 = vadd.f32 %v2895_v4, %v3288_v39  ;;  %v514_v9 = vpop.f32.mrb[17].mxu0  ;;  %v590_v12 = vmax.f32 %v502_v3, 0.0  ;;  %2799 = vmatprep.subr.bf16.mxu0 %v3004_v63 }
 0x110   : > { %v816_v10 = vrot.slane %v814_v2, 7  ;;  %v515_v13 = vadd.f32 %v3288_v39, %v514_v9  ;;  %v3372_v14 = vpop.f32.mrb[18].mxu0  ;;  %v582_v29 = vmax.f32 %v3362_v0, 0.0  ;;  %v579_v35 = vmax.f32 %v3352_v59, 0.0  ;;  %v911_v49 = vld [vmem:[#allocation2 + $0x7c] sm:$0x1]  ;;  %2718 = vmatpush3.bf16.msra.mxu1 %v3001_v48 }
 0x111   : > { %v3380_v17 = vor.u32 %v833_v6, %v832_v5  ;;  %v836_v18 = vrot.slane %v832_v5, 4  ;;  %v2674_v20 = vpack.c.bf16 %v592_v7, %v592_v7  ;;  %v595_v21 = vmax.f32 %v523_v8, 0.0  ;;  %v517_v22 = vpop.f32.mrb[19].mxu0  ;;  %v899_v61 = vld [vmem:[#allocation2 + $0x5c] sm:$0x1]  ;;  %v3003_v4 = vld [vmem:[%s3997_s3 + $0xe0] sm:$0xff]  }
 0x112   : > { %v3385_v25 = vor.u32 %v817_v11, %v816_v10  ;;  %v820_v26 = vrot.slane %v816_v10, 4  ;;  %v2672_v27 = vpack.c.bf16 %v590_v12, %v590_v12  ;;  %v593_v28 = vmax.f32 %v515_v13, 0.0  ;;  %v3006_v5 = vld [vmem:[%s3997_s3 + $0x120] sm:$0xff]   ;;  %2719 = vmatprep.subr.bf16.mxu1 %v3003_v4 }
 0x113   : > { %v906_v31 = vsel %vm3324_vm9, %v836_v18, %v905_v1  ;;  %v838_v32 = vshrl.u32 %v2674_v20, 16  ;;  %v2677_v33 = vpack.c.bf16 %v595_v21, %v595_v21  ;;  %v841_v45 = vshll.u32 %v2674_v20, 16  ;;  %2800 = vmatpush3.bf16.msra.mxu0 %v3006_v5  ;;  %v3010_v20 = vld [vmem:[%s3997_s3 + $0x128] sm:$0xff]  }
 0x114   : > { %907 = vst [vmem:[#allocation2 + $0x6c] sm:$0x1] %v906_v31  ;;  %v894_v37 = vsel %vm3324_vm9, %v820_v26, %v893_v19  ;;  %v822_v38 = vshrl.u32 %v2672_v27, 16  ;;  %v518_v46 = vadd.f32 %v3288_v39, %v517_v22  ;;  %v2675_v47 = vpack.c.bf16 %v593_v28, %v593_v28  ;;  %2720 = vmatpush3.bf16.msra.mxu1 %v3005_v55  ;;  %v3007_v19 = vld [vmem:[%s3997_s3 + $0xe8] sm:$0xff]  }
 0x115   : > { %895 = vst [vmem:[#allocation2 + $0x4c] sm:$0x1] %v894_v37  ;;  %v840_v43 = vrot.slane %v838_v32, 7  ;;  %918 = vrot.lane.b32.xlu0 %v2677_v33, %s3132_s23  ;;  %v825_v56 = vshll.u32 %v2672_v27, 16  ;;  %v2664_v58 = vpack.c.bf16 %v582_v29, %v582_v29  ;;  %v478_v0 = vadd.f32 %v3300_v54, %v3288_v39  ;;  %2721 = vmatprep.subr.bf16.mxu1 %v3007_v19  ;;  %v3012_v29 = vld [vmem:[%s3997_s3 + $0x170] sm:$0xff]  }
 0x116   : > { %v824_v53 = vrot.slane %v822_v38, 7  ;;  %v2899_v57 = vpop.f32.mrb[20].mxu0  ;;  %914 = vrot.lane.b32.xlu1 %v2675_v47, %s3132_s23  ;;  %v2661_v6 = vpack.c.bf16 %v579_v35, %v579_v35  ;;  %v467_v7 = vadd.f32 %v3288_v39, %v3298_v51  ;;  %v594_v8 = vmax.f32 %v518_v46, 0.0  ;;  %v3008_v51 = vld [vmem:[%s3997_s3 + $0x168] sm:$0xff]   ;;  %v3011_v37 = vld [vmem:[%s3997_s3 + $0xf0] sm:$0xff]  }
 0x117   : > { %v3407_v59 = vor.u32 %v841_v45, %v840_v43  ;;  %v844_v60 = vrot.slane %v840_v43, 4  ;;  %v530_v62 = vpop.f32.mrb[21].mxu0  ;;  %v539_v11 = vadd.f32 %v2899_v57, %v3288_v39  ;;  %v475_v13 = vadd.f32 %v3295_v50, %v3288_v39  ;;  %2801 = vmatprep.subr.bf16.mxu0 %v3008_v51  ;;  %v3009_v50 = vld [vmem:[%s3997_s3 + $0xa8] sm:$0xff]   ;;  %v3014_v38 = vld [vmem:[%s3997_s3 + $0x130] sm:$0xff]  }
 0x118   : > { %v3415_v40 = vor.u32 %v825_v56, %v824_v53  ;;  %v828_v1 = vrot.slane %v824_v53, 4  ;;  %v531_v2 = vadd.f32 %v3288_v39, %v530_v62  ;;  %v2900_v3 = vpop.f32.mrb[22].mxu0  ;;  %v584_v15 = vmax.f32 %v478_v0, 0.0  ;;  %2722 = vmatpush3.bf16.msra.mxu1 %v3009_v50  ;;  %2802 = vmatpush3.bf16.msra.mxu0 %v3010_v20  ;;  %v3013_v47 = vld [vmem:[%s3997_s3 + $0xb0] sm:$0xff]  }
 0x119   : > { %v912_v54 = vsel %vm3324_vm9, %v844_v60, %v911_v49  ;;  %758 = vrot.lane.b32.xlu0 %v2664_v58, %s3132_s23  ;;  %v533_v9 = vpop.f32.mrb[23].mxu0  ;;  %v526_v16 = vadd.f32 %v3372_v14, %v3288_v39  ;;  %v581_v21 = vmax.f32 %v467_v7, 0.0  ;;  %v2676_v22 = vpack.c.bf16 %v594_v8, %v594_v8  ;;  %2803 = vmatprep.subr.bf16.mxu0 %v3012_v29  ;;  %v3016_v60 = vld [vmem:[%s3997_s3 + $0x178] sm:$0xff]  }
 0x11a   : > { %913 = vst [vmem:[#allocation2 + $0x7c] sm:$0x1] %v912_v54  ;;  %v900_v10 = vsel %vm3324_vm9, %v828_v1, %v899_v61  ;;  %v597_v12 = vmax.f32 %v531_v2, 0.0  ;;  %752 = vrot.lane.b32.xlu1 %v2661_v6, %s3132_s23  ;;  %v599_v24 = vmax.f32 %v539_v11, 0.0  ;;  %v534_v26 = vadd.f32 %v3288_v39, %v533_v9  ;;  %2723 = vmatprep.subr.bf16.mxu1 %v3011_v37  ;;  %v3015_v1 = vld [vmem:[%s3997_s3 + $0xf8] sm:$0xff]  }
 0x11b   : > { %901 = vst [vmem:[#allocation2 + $0x5c] sm:$0x1] %v900_v10  ;;  %v583_v31 = vmax.f32 %v475_v13, 0.0  ;;  %v2666_v32 = vpack.c.bf16 %v584_v15, %v584_v15  ;;  %v596_v33 = vmax.f32 %v526_v16, 0.0  ;;  %v2663_v41 = vpack.c.bf16 %v581_v21, %v581_v21  ;;  %v3018_v2 = vld [vmem:[%s3997_s3 + $0x138] sm:$0xff]  }
 0x11c   : > { %v2679_v18 = vpack.c.bf16 %v597_v12, %v597_v12  ;;  %v3467_v42 = vadd.f32 %v2900_v3, %v3288_v39  ;;  %v2681_v48 = vpack.c.bf16 %v599_v24, %v599_v24  ;;  %v598_v49 = vmax.f32 %v534_v26, 0.0  ;;  %2724 = vmatpush3.bf16.msra.mxu1 %v3013_v47  ;;  %2804 = vmatpush3.bf16.msra.mxu0 %v3014_v38  ;;  %v3017_v7 = vld [vmem:[%s3997_s3 + $0xb8] sm:$0xff]   ;;  %v3021_v24 = vld [vmem:[%s3997_s3 + $0x40] sm:$0xff]  }
 0x11d   : > { %v2665_v61 = vpack.c.bf16 %v583_v31, %v583_v31  ;;  %v2678_v62 = vpack.c.bf16 %v596_v33, %v596_v33  ;;  %2805 = vmatprep.subr.bf16.mxu0 %v3016_v60  ;;  %v1042_v8 = vld [vmem:[#allocation2 + $0x38] sm:$0x1]  ;;  %2725 = vmatprep.subr.bf16.mxu1 %v3015_v1 }
 0x11e   : > { %v2903_v14 = vpop.f32.mrb[24].mxu0  ;;  %922 = vrot.lane.b32.xlu0 %v2679_v18, %s3132_s23  ;;  %916 = vrot.lane.b32.xlu1 %v2676_v22, %s3132_s23  ;;  %v600_v3 = vmax.f32 %v3467_v42, 0.0  ;;  %v2680_v54 = vpack.c.bf16 %v598_v49, %v598_v49  ;;  %v3495_v18 = vld [vmem:[%s3997_s3 + $0x1c0] sm:$0xff]  }
 0x11f   : > { %v555_v27 = vadd.f32 %v2903_v14, %v3288_v39  ;;  %v546_v28 = vpop.f32.mrb[25].mxu0 }
 0x120   : > { %v547_v34 = vadd.f32 %v3288_v39, %v546_v28  ;;  %v2904_v35 = vpop.f32.mrb[26].mxu0  ;;  %2726 = vmatpush3.bf16.msra.mxu1 %v3017_v7  ;;  %2806 = vmatpush3.bf16.msra.mxu0 %v3018_v2  ;;  %v2682_v7 = vpack.c.bf16 %v600_v3, %v600_v3 }
 0x121   : > { %v603_v43 = vmax.f32 %v555_v27, 0.0  ;;  %v558_v45 = vadd.f32 %v2904_v35, %v3288_v39  ;;  %v549_v46 = vpop.f32.mrb[27].mxu0  ;;  %v1030_v27 = vld [vmem:[#allocation2 + $0x18] sm:$0x1]  ;;  %2831 = vmatprep.subr.bf16.mxu0 %v3495_v18  ;;  %2751 = vmatprep.subr.bf16.mxu1 %v3021_v24 }
 0x122   : > { %v601_v53 = vmax.f32 %v547_v34, 0.0  ;;  %v550_v56 = vadd.f32 %v3288_v39, %v549_v46  ;;  %762 = vrot.lane.b32.xlu0 %v2666_v32, %s3132_s23  ;;  %756 = vrot.lane.b32.xlu1 %v2663_v41, %s3132_s23  ;;  %v1048_v34 = vld [vmem:[#allocation2 + $0x48] sm:$0x1] }
 0x123   : > { %v2685_v57 = vpack.c.bf16 %v603_v43, %v603_v43  ;;  %v604_v58 = vmax.f32 %v558_v45, 0.0  ;;  %v1036_v45 = vld [vmem:[#allocation2 + $0x28] sm:$0x1] }
 0x124   : > { %v2683_v63 = vpack.c.bf16 %v601_v53, %v601_v53  ;;  %v602_v0 = vmax.f32 %v550_v56, 0.0 }
 0x125   : > { %v964_v4 = vshrl.u32 %v2685_v57, 16  ;;  %v967_v5 = vshll.u32 %v2685_v57, 16  ;;  %v2686_v6 = vpack.c.bf16 %v604_v58, %v604_v58 }
 0x126   : > { %v948_v9 = vshrl.u32 %v2683_v63, 16  ;;  %v951_v55 = vshll.u32 %v2683_v63, 16  ;;  %v2684_v10 = vpack.c.bf16 %v602_v0, %v602_v0  ;;  %v2907_v11 = vpop.f32.mrb[28].mxu0  ;;  %926 = vrot.lane.b32.xlu0 %v2681_v48, %s3132_s23  ;;  %920 = vrot.lane.b32.xlu1 %v2678_v62, %s3132_s23 }
 0x127   : > { %v966_v12 = vrot.slane %v964_v4, 7  ;;  %v972_v51 = vshrl.u32 %v2686_v6, 16  ;;  %v975_v13 = vshll.u32 %v2686_v6, 16  ;;  %v571_v15 = vadd.f32 %v2907_v11, %v3288_v39  ;;  %v562_v16 = vpop.f32.mrb[29].mxu0  ;;  %v1066_v4 = vld [vmem:[#allocation2 + $0x78] sm:$0x1] }
 0x128   : > { %v950_v19 = vrot.slane %v948_v9, 7  ;;  %v956_v20 = vshrl.u32 %v2684_v10, 16  ;;  %v959_v21 = vshll.u32 %v2684_v10, 16  ;;  %v563_v22 = vadd.f32 %v3288_v39, %v562_v16  ;;  %v2908_v50 = vpop.f32.mrb[30].mxu0 }
 0x129   : > { %v3501_v26 = vor.u32 %v967_v5, %v966_v12  ;;  %v970_v14 = vrot.slane %v966_v12, 4  ;;  %v974_v28 = vrot.slane %v972_v51, 7  ;;  %v607_v29 = vmax.f32 %v571_v15, 0.0  ;;  %v565_v31 = vpop.f32.mrb[31].mxu0 }
 0x12a   : > { %v3504_v32 = vor.u32 %v951_v55, %v950_v19  ;;  %v954_v33 = vrot.slane %v950_v19, 4  ;;  %v958_v35 = vrot.slane %v956_v20, 7  ;;  %v605_v37 = vmax.f32 %v563_v22, 0.0  ;;  %760 = vrot.lane.b32.xlu1 %v2665_v61, %s3132_s23  ;;  %v1054_v55 = vld [vmem:[#allocation2 + $0x58] sm:$0x1] }
 0x12b   : > { %v1043_v38 = vsel %vm3324_vm9, %v970_v14, %v1042_v8  ;;  %v3508_v41 = vor.u32 %v975_v13, %v974_v28  ;;  %v978_v43 = vrot.slane %v974_v28, 4  ;;  %v2689_v46 = vpack.c.bf16 %v607_v29, %v607_v29  ;;  %v1072_v19 = vld [vmem:[#allocation2 + $0x88] sm:$0x1] }
 0x12c   : > { %1044 = vst [vmem:[#allocation2 + $0x38] sm:$0x1] %v1043_v38  ;;  %v1031_v47 = vsel %vm3324_vm9, %v954_v33, %v1030_v27  ;;  %v3513_v48 = vor.u32 %v959_v21, %v958_v35  ;;  %v962_v49 = vrot.slane %v958_v35, 4  ;;  %v2687_v53 = vpack.c.bf16 %v605_v37, %v605_v37  ;;  %v3735_v33 = vld [vmem:[%s3997_s3 + $0x1e0] sm:$0xff]  }
 0x12d   : > { %1032 = vst [vmem:[#allocation2 + $0x18] sm:$0x1] %v1031_v47  ;;  %v1049_v56 = vsel %vm3324_vm9, %v978_v43, %v1048_v34  ;;  %v996_v57 = vshrl.u32 %v2689_v46, 16  ;;  %v999_v58 = vshll.u32 %v2689_v46, 16  ;;  %v574_v60 = vadd.f32 %v2908_v50, %v3288_v39  ;;  %v1060_v50 = vld [vmem:[#allocation2 + $0x68] sm:$0x1] }
 0x12e   : > { %1050 = vst [vmem:[#allocation2 + $0x48] sm:$0x1] %v1049_v56  ;;  %v1037_v61 = vsel %vm3324_vm9, %v962_v49, %v1036_v45  ;;  %v980_v62 = vshrl.u32 %v2687_v53, 16  ;;  %v983_v63 = vshll.u32 %v2687_v53, 16  ;;  %v566_v0 = vadd.f32 %v3288_v39, %v565_v31  ;;  %924 = vrot.lane.b32.xlu1 %v2680_v54, %s3132_s23 }
 0x12f   : > { %1038 = vst [vmem:[#allocation2 + $0x28] sm:$0x1] %v1037_v61  ;;  %v998_v1 = vrot.slane %v996_v57, 7  ;;  %v608_v2 = vmax.f32 %v574_v60, 0.0 }
 0x130   : > { %v982_v5 = vrot.slane %v980_v62, 7  ;;  %v606_v6 = vmax.f32 %v566_v0, 0.0 }
 0x131   : > { %v3525_v8 = vor.u32 %v999_v58, %v998_v1  ;;  %v1002_v9 = vrot.slane %v998_v1, 4  ;;  %v2690_v10 = vpack.c.bf16 %v608_v2, %v608_v2 }
 0x132   : > { %v3527_v11 = vor.u32 %v983_v63, %v982_v5  ;;  %v986_v39 = vrot.slane %v982_v5, 4  ;;  %v2688_v12 = vpack.c.bf16 %v606_v6, %v606_v6  ;;  %928 = vrot.lane.b32.xlu1 %v2682_v7, %s3132_s23  ;;  %s3913_s23 = scalar_lea.vmem [#allocation3], %s2389_s10 }
 0x133   : > { %v1067_v51 = vsel %vm3324_vm9, %v1002_v9, %v1066_v4  ;;  %v1004_v54 = vshrl.u32 %v2690_v10, 16  ;;  %v1007_v13 = vshll.u32 %v2690_v10, 16  ;;  %v1115_v9 = vld [vmem:[#allocation2 + $0x8] sm:$0x11]  ;;  %s2323_s12 = sshll.u32 %s3913_s23, 4  ;;  %s3945_s12 = int_to_ptr.vmem [resolvable:$true] %s2323_s12 }
 0x134   : > { %1068 = vst [vmem:[#allocation2 + $0x78] sm:$0x1] %v1067_v51  ;;  %v1055_v42 = vsel %vm3324_vm9, %v986_v39, %v1054_v55  ;;  %v988_v3 = vshrl.u32 %v2688_v12, 16  ;;  %v991_v15 = vshll.u32 %v2688_v12, 16  ;;  %v1116_v51 = vld [vmem:[#allocation2 + $0x18] sm:$0x11]  ;;  %p3074_p0 = scmp.lt.s32.totalorder %s3945_s12, %s3072_s25 }
 0x135   : > { %1056 = vst [vmem:[#allocation2 + $0x58] sm:$0x1] %v1055_v42  ;;  %v1006_v16 = vrot.slane %v1004_v54, 7  ;;  %s3067_s16 = scalar_lea.vmem %s3945_s12, 1024 }
 0x136   : > { %v990_v20 = vrot.slane %v988_v3, 7  ;;  %p3068_p11 = scmp.ne.s32.totalorder %s3945_s12, %s3067_s16  ;;  %p3075_p1 = scmp.lt.s32.totalorder %s3073_s26, %s3067_s16 }
 0x137   : > { %v3534_v21 = vor.u32 %v1007_v13, %v1006_v16  ;;  %v1010_v22 = vrot.slane %v1006_v16, 4  ;;  %v1136_v13 = vshll.u32 %v1115_v9, 16 }
 0x138   : > { %v3536_v24 = vor.u32 %v991_v15, %v990_v20  ;;  %v994_v14 = vrot.slane %v990_v20, 4  ;;  %p3069_p12 = pnand %p3068_p11, %p3204_p5  ;;  %p3076_p2 = por %p3075_p1, %p3074_p0 }
 0x139   : > { %v1073_v27 = vsel %vm3324_vm9, %v1010_v22, %v1072_v19 }
 0x13a   : > { %1074 = vst [vmem:[#allocation2 + $0x88] sm:$0x1] %v1073_v27  ;;  %v1061_v28 = vsel %vm3324_vm9, %v994_v14, %v1060_v50  ;;  %v1150_v14 = vshll.u32 %v1116_v51, 16  ;;  %p3070_p13 = pneg %p3069_p12 }
 0x13b   : > { %1062 = vst [vmem:[#allocation2 + $0x68] sm:$0x1] %v1061_v28 }
 0x13c   : > { %p3077_p3 = pnand %p3076_p2, %p3070_p13 }
 0x168   : > { %v749_v29 = vpop.permute.xlu0 %748 }
 0x169   : > { %773 = vst.msk [vmem:[#allocation2 + $0x4] sm:$0xf] %vm772_vm10, %v749_v29 }
 0x16c   : > { %v751_v31 = vpop.permute.xlu0 %750 }
 0x16d   : > { %774 = vst.msk [vmem:[#allocation2 + $0x14] sm:$0xf] %vm772_vm10, %v751_v31  ;;  %v1138_v31 = vrot.slane %v1136_v13, 5  ;;  %v1120_v13 = vld [vmem:[#allocation2 + $0x58] sm:$0x11] }
 0x170   : > { %v864_v34 = vld [vmem:[#allocation2 + $0x4] sm:$0xf]  ;;  %v755_v35 = vpop.permute.xlu0 %754 }
 0x171   : > { %v865_v23 = vsel %vm3544_vm13, %v3331_v36, %v864_v34  ;;  %776 = vst.msk [vmem:[#allocation2 + $0x34] sm:$0xf] %vm772_vm10, %v755_v35  ;;  %v1118_v35 = vld [vmem:[#allocation2 + $0x38] sm:$0x11] }
 0x172   : > { %866 = vst [vmem:[#allocation2 + $0x4] sm:$0xf] %v865_v23  ;;  %v1178_v9 = vshll.u32 %v1118_v35, 16  ;;  %v3696_v35 = vld [vmem:[%s3997_s3 + $0x190] sm:$0xff]  }
 0x174   : > { %v872_v37 = vld [vmem:[#allocation2 + $0x14] sm:$0xf] }
 0x175   : > { %v873_v38 = vsel %vm3544_vm13, %v3342_v52, %v872_v37 }
 0x176   : > { %874 = vst [vmem:[#allocation2 + $0x14] sm:$0xf] %v873_v38 }
 0x178   : > { %v884_v43 = vld [vmem:[#allocation2 + $0x34] sm:$0xf] }
 0x179   : > { %v885_v45 = vsel %vm3544_vm13, %v3335_v44, %v884_v43  ;;  %v3562_v53 = vld [vmem:[#allocation2] sm:$0xff] }
 0x17a   : > { %886 = vst [vmem:[#allocation2 + $0x34] sm:$0xf] %v885_v45  ;;  %v1127_v61 = vshrl.u32 %v3562_v53, 16  ;;  %v1130_v62 = vshll.u32 %v3562_v53, 16 }
 0x17c   : > { %v1129_v4 = vrot.slane %v1127_v61, 4  ;;  %v1132_v5 = vrot.slane %v1130_v62, 5 }
 0x17e   : > { %v1133_v54 = vor.u32 %v1132_v5, %v1129_v4  ;;  %v3025_v5 = vld [vmem:[%s3997_s3 + $0x48] sm:$0xff]  }
 0x180   : > { %v1134_v28 = vrot.slane %v1133_v54, 4  ;;  %v3662_v54 = vld [vmem:[%s3997_s3 + $0x188] sm:$0xff]  }
 0x187   : > { %v919_v46 = vpop.permute.xlu0 %918 }
 0x188   : > { %941 = vst.msk [vmem:[#allocation2 + $0x30] sm:$0xf] %vm772_vm10, %v919_v46  ;;  %v915_v47 = vpop.permute.xlu1 %914  ;;  %v1152_v46 = vrot.slane %v1150_v14, 5 }
 0x189   : > { %939 = vst.msk [vmem:[#allocation2 + $0x10] sm:$0xf] %vm772_vm10, %v915_v47 }
 0x18b   : > { %v759_v36 = vpop.permute.xlu0 %758 }
 0x18c   : > { %778 = vst.msk [vmem:[#allocation2 + $0x54] sm:$0xf] %vm772_vm10, %v759_v36  ;;  %v753_v49 = vpop.permute.xlu1 %752 }
 0x18d   : > { %775 = vst.msk [vmem:[#allocation2 + $0x24] sm:$0xf] %vm772_vm10, %v753_v49 }
 0x18f   : > { %v1039_v52 = vld [vmem:[#allocation2 + $0x30] sm:$0xf] }
 0x190   : > { %v1040_v44 = vsel %vm3544_vm13, %v3501_v26, %v1039_v52  ;;  %v923_v56 = vpop.permute.xlu0 %922  ;;  %v1027_v57 = vld [vmem:[#allocation2 + $0x10] sm:$0xf]  ;;  %v917_v58 = vpop.permute.xlu1 %916  ;;  %v1139_v52 = vsel %vm3606_vm0, %v1134_v28, %v1138_v31  ;;  %v1206_v31 = vshll.u32 %v1120_v13, 16 }
 0x191   : > { %1041 = vst [vmem:[#allocation2 + $0x30] sm:$0xf] %v1040_v44  ;;  %943 = vst.msk [vmem:[#allocation2 + $0x50] sm:$0xf] %vm772_vm10, %v923_v56  ;;  %v1028_v60 = vsel %vm3544_vm13, %v3504_v32, %v1027_v57  ;;  %v1117_v44 = vld [vmem:[#allocation2 + $0x28] sm:$0x11] }
 0x192   : > { %940 = vst.msk [vmem:[#allocation2 + $0x20] sm:$0xf] %vm772_vm10, %v917_v58  ;;  %1029 = vst [vmem:[#allocation2 + $0x10] sm:$0xf] %v1028_v60  ;;  %v3637_v60 = vld [vmem:[%s3997_s3 + $0x180] sm:$0xff]  }
 0x193   : > { %v896_v63 = vld [vmem:[#allocation2 + $0x54] sm:$0xf] }
 0x194   : > { %v897_v26 = vsel %vm3544_vm13, %v3415_v40, %v896_v63  ;;  %v763_v0 = vpop.permute.xlu0 %762  ;;  %v878_v1 = vld [vmem:[#allocation2 + $0x24] sm:$0xf]  ;;  %v757_v2 = vpop.permute.xlu1 %756 }
 0x195   : > { %898 = vst [vmem:[#allocation2 + $0x54] sm:$0xf] %v897_v26  ;;  %780 = vst.msk [vmem:[#allocation2 + $0x74] sm:$0xf] %vm772_vm10, %v763_v0  ;;  %v879_v32 = vsel %vm3544_vm13, %v3329_v30, %v878_v1  ;;  %v3023_v26 = vld [vmem:[%s3997_s3] sm:$0xff]   ;;  %v3646_v0 = vld [vmem:[%s3997_s3 + $0x1c8] sm:$0xff]  }
 0x196   : > { %777 = vst.msk [vmem:[#allocation2 + $0x44] sm:$0xf] %vm772_vm10, %v757_v2  ;;  %880 = vst [vmem:[#allocation2 + $0x24] sm:$0xf] %v879_v32 }
 0x198   : > { %v1051_v6 = vld [vmem:[#allocation2 + $0x50] sm:$0xf]  ;;  %v927_v7 = vpop.permute.xlu0 %926  ;;  %v921_v10 = vpop.permute.xlu1 %920 }
 0x199   : > { %v1033_v55 = vld [vmem:[#allocation2 + $0x20] sm:$0xf]  ;;  %v1052_v40 = vsel %vm3544_vm13, %v3527_v11, %v1051_v6  ;;  %945 = vst.msk [vmem:[#allocation2 + $0x70] sm:$0xf] %vm772_vm10, %v927_v7  ;;  %v3586_v39 = vld [vmem:[#allocation2 + $0x30] sm:$0xff]  ;;  %v1164_v7 = vshll.u32 %v1117_v44, 16 }
 0x19a   : > { %v1034_v30 = vsel %vm3544_vm13, %v3513_v48, %v1033_v55  ;;  %1053 = vst [vmem:[#allocation2 + $0x50] sm:$0xf] %v1052_v40  ;;  %942 = vst.msk [vmem:[#allocation2 + $0x40] sm:$0xf] %vm772_vm10, %v921_v10  ;;  %v3592_v12 = vld [vmem:[#allocation2 + $0x10] sm:$0xff]  ;;  %v1169_v15 = vshrl.u32 %v3586_v39, 16 }
 0x19b   : > { %1035 = vst [vmem:[#allocation2 + $0x20] sm:$0xf] %v1034_v30  ;;  %v1141_v11 = vshrl.u32 %v3592_v12, 16  ;;  %v1144_v42 = vshll.u32 %v3592_v12, 16  ;;  %v1172_v48 = vshll.u32 %v3586_v39, 16 }
 0x19c   : > { %v908_v3 = vld [vmem:[#allocation2 + $0x74] sm:$0xf]  ;;  %v761_v20 = vpop.permute.xlu1 %760  ;;  %v1171_v23 = vrot.slane %v1169_v15, 4  ;;  %v3656_v10 = vld [vmem:[#allocation2 + $0x48] sm:$0x11] }
 0x19d   : > { %v890_v16 = vld [vmem:[#allocation2 + $0x44] sm:$0xf]  ;;  %v909_v19 = vsel %vm3544_vm13, %v3407_v59, %v908_v3  ;;  %v1143_v22 = vrot.slane %v1141_v11, 4  ;;  %v1146_v50 = vrot.slane %v1144_v42, 5  ;;  %779 = vst.msk [vmem:[#allocation2 + $0x64] sm:$0xf] %vm772_vm10, %v761_v20 }
 0x19e   : > { %v891_v27 = vsel %vm3544_vm13, %v3385_v25, %v890_v16  ;;  %910 = vst [vmem:[#allocation2 + $0x74] sm:$0xf] %v909_v19  ;;  %v1174_v37 = vrot.slane %v1172_v48, 5  ;;  %v3030_v3 = vld [vmem:[%s3997_s3 + $0x50] sm:$0xff]   ;;  %v1166_v16 = vrot.slane %v1164_v7, 5  ;;  %v1180_v19 = vrot.slane %v1178_v9, 5 }
 0x19f   : > { %892 = vst [vmem:[#allocation2 + $0x44] sm:$0xf] %v891_v27  ;;  %v1147_v59 = vor.u32 %v1146_v50, %v1143_v22  ;;  %v3676_v15 = vld [vmem:[%s3997_s3 + $0x1d0] sm:$0xff]   ;;  %v1192_v20 = vshll.u32 %v3656_v10, 16  ;;  %v3040_v7 = vld [vmem:[%s3997_s3 + $0x60] sm:$0xff]  }
 0x1a0   : > { %v1063_v34 = vld [vmem:[#allocation2 + $0x70] sm:$0xf]  ;;  %v925_v43 = vpop.permute.xlu1 %924  ;;  %v1175_v2 = vor.u32 %v1174_v37, %v1171_v23  ;;  %v1918_v9 = vld [vmem:[#allocation2 + $0x28] sm:$0x11] }
 0x1a1   : > { %v1045_v38 = vld [vmem:[#allocation2 + $0x40] sm:$0xf]  ;;  %v1064_v25 = vsel %vm3544_vm13, %v3525_v8, %v1063_v34  ;;  %v3613_v45 = vrot.slane %v1147_v59, 4  ;;  %v3615_v47 = vld [vmem:[#allocation2 + $0x50] sm:$0xff]  ;;  %944 = vst.msk [vmem:[#allocation2 + $0x60] sm:$0xf] %vm772_vm10, %v925_v43 }
 0x1a2   : > { %v1046_v36 = vsel %vm3544_vm13, %v3508_v41, %v1045_v38  ;;  %1065 = vst [vmem:[#allocation2 + $0x70] sm:$0xf] %v1064_v25  ;;  %v3621_v49 = vld [vmem:[#allocation2 + $0x20] sm:$0xff]  ;;  %v1197_v8 = vshrl.u32 %v3615_v47, 16  ;;  %v1200_v56 = vshll.u32 %v3615_v47, 16  ;;  %v3668_v42 = vrot.slane %v1175_v2, 4 }
 0x1a3   : > { %1047 = vst [vmem:[#allocation2 + $0x40] sm:$0xf] %v1046_v36  ;;  %v2572_v57 = vcombine.low %v3592_v12, %v3621_v49  ;;  %v2573_v41 = vcombine.high %v3592_v12, %v3621_v49  ;;  %v1153_v58 = vsel %vm3606_vm0, %v3613_v45, %v1152_v46  ;;  %v1155_v61 = vshrl.u32 %v3621_v49, 16  ;;  %v3710_v25 = vld [vmem:[%s3997_s3 + $0x1d8] sm:$0xff]  }
 0x1a4   : > { %v2492_v62 = vcombine.low %v1139_v52, %v1153_v58  ;;  %v2493_v63 = vcombine.high %v1139_v52, %v1153_v58  ;;  %v1158_v1 = vshll.u32 %v3621_v49, 16  ;;  %v902_v32 = vld [vmem:[#allocation2 + $0x64] sm:$0xf]  ;;  %v929_v4 = vpop.permute.xlu1 %928  ;;  %v1199_v30 = vrot.slane %v1197_v8, 4  ;;  %v3033_v8 = vld [vmem:[%s3997_s3 + $0x10] sm:$0xff]   ;;  %v3035_v58 = vld [vmem:[%s3997_s3 + $0x58] sm:$0xff]  }
 0x1a5   : > { %1874 = vmatprep.mubr.bf16.mxu0 %v2573_v41  ;;  %v1157_v6 = vrot.slane %v1155_v61, 4  ;;  %v903_v55 = vsel %vm3544_vm13, %v3380_v17, %v902_v32  ;;  %946 = vst.msk [vmem:[#allocation2 + $0x80] sm:$0xf] %vm772_vm10, %v929_v4  ;;  %v1202_v51 = vrot.slane %v1200_v56, 5  ;;  %v3027_v17 = vld [vmem:[%s3997_s3 + $0x8] sm:$0xff]   ;;  %v1181_v38 = vsel %vm3606_vm0, %v3668_v42, %v1180_v19  ;;  %v3037_v2 = vld [vmem:[%s3997_s3 + $0x18] sm:$0xff]  }
 0x1a6   : > { %1431 = vmatprep.mubr.bf16.mxu1 %v2493_v63  ;;  %1875 = vmatmul.mubr.bf16.vlgmr.msra.gmra.mrb[32].mxu0 %v2572_v57  ;;  %v1160_v40 = vrot.slane %v1158_v1, 5  ;;  %904 = vst [vmem:[#allocation2 + $0x64] sm:$0xf] %v903_v55  ;;  %v1194_v4 = vrot.slane %v1192_v20, 5  ;;  %v3043_v19 = vld [vmem:[%s3997_s3 + $0x20] sm:$0xff]   ;;  %v3046_v20 = vld [vmem:[%s3997_s3 + $0x68] sm:$0xff]  }
 0x1a7   : > { %1432 = vmatmul.mubr.bf16.vlgmr.msra.gmra.mrb[0].mxu1 %v2492_v62  ;;  %2832 = vmatpush3.bf16.msra.mxu0 %v3637_v60  ;;  %v1203_v28 = vor.u32 %v1202_v51, %v1199_v30  ;;  %v3729_v62 = vld [vmem:[%s3997_s3 + $0x198] sm:$0xff]   ;;  %v1121_v30 = vld [vmem:[#allocation2 + $0x68] sm:$0x11] }
 0x1a8   : > { %2752 = vmatpush3.bf16.msra.mxu1 %v3023_v26  ;;  %2833 = vmatprep.subr.bf16.mxu0 %v3646_v0  ;;  %v1161_v11 = vor.u32 %v1160_v40, %v1157_v6  ;;  %v1057_v48 = vld [vmem:[#allocation2 + $0x60] sm:$0xf]  ;;  %v1122_v51 = vld [vmem:[#allocation2 + $0x78] sm:$0x11] }
 0x1a9   : > { %2753 = vmatprep.subr.bf16.mxu1 %v3025_v5  ;;  %v3679_v22 = vld [vmem:[#allocation2 + $0x70] sm:$0xff]  ;;  %v1058_v50 = vsel %vm3544_vm13, %v3536_v24, %v1057_v48  ;;  %v3723_v61 = vrot.slane %v1203_v28, 4  ;;  %v1916_v28 = vld [vmem:[#allocation2 + $0x18] sm:$0x11] }
 0x1aa   : > { %v3684_v14 = vld [vmem:[#allocation2 + $0x40] sm:$0xff]  ;;  %v3686_v27 = vrot.slane %v1161_v11, 4  ;;  %1059 = vst [vmem:[#allocation2 + $0x60] sm:$0xf] %v1058_v50  ;;  %v1225_v43 = vshrl.u32 %v3679_v22, 16  ;;  %v1228_v46 = vshll.u32 %v3679_v22, 16 }
 0x1ab   : > { %2834 = vmatpush3.bf16.msra.mxu0 %v3662_v54  ;;  %v2575_v59 = vcombine.high %v3586_v39, %v3684_v14  ;;  %v2574_v34 = vcombine.low %v3586_v39, %v3684_v14  ;;  %v1183_v24 = vshrl.u32 %v3684_v14, 16  ;;  %v1186_v23 = vshll.u32 %v3684_v14, 16 }
 0x1ac   : > { %2754 = vmatpush3.bf16.msra.mxu1 %v3027_v17  ;;  %v1167_v37 = vsel %vm3606_vm0, %v3686_v27, %v1166_v16  ;;  %2835 = vmatprep.subr.bf16.mxu0 %v3676_v15  ;;  %v1069_v36 = vld [vmem:[#allocation2 + $0x80] sm:$0xf]  ;;  %v1227_v26 = vrot.slane %v1225_v43, 4  ;;  %v1230_v1 = vrot.slane %v1228_v46, 5  ;;  %v3785_v43 = vld [vmem:[%s3997_s3 + $0x1a8] sm:$0xff]  }
 0x1ad   : > { %1882 = vmatprep.mubr.bf16.mxu0 %v2575_v59  ;;  %v2495_v52 = vcombine.high %v1167_v37, %v1181_v38  ;;  %2755 = vmatprep.subr.bf16.mxu1 %v3030_v3  ;;  %v2494_v44 = vcombine.low %v1167_v37, %v1181_v38  ;;  %v1185_v56 = vrot.slane %v1183_v24, 4  ;;  %v1188_v57 = vrot.slane %v1186_v23, 5  ;;  %v3763_v3 = vld [vmem:[%s3997_s3 + $0x1a0] sm:$0xff]   ;;  %v3777_v59 = vld [vmem:[%s3997_s3 + $0x1e8] sm:$0xff]  }
 0x1ae   : > { %v1070_v41 = vsel %vm3544_vm13, %v3534_v21, %v1069_v36  ;;  %1883 = vmatmul.mubr.bf16.gmra.mrb[36].mxu0 %v2574_v34  ;;  %v1208_v21 = vrot.slane %v1206_v31, 5  ;;  %v1231_v16 = vor.u32 %v1230_v1, %v1227_v26  ;;  %v1220_v24 = vshll.u32 %v1121_v30, 16  ;;  %v3813_v1 = vld [vmem:[%s3997_s3 + $0x1b0] sm:$0xff]   ;;  %v3057_v30 = vld [vmem:[%s3997_s3 + $0x1f8] sm:$0xff]  }
 0x1af   : > { %1071 = vst [vmem:[#allocation2 + $0x80] sm:$0xf] %v1070_v41  ;;  %1439 = vmatprep.mubr.bf16.mxu1 %v2495_v52  ;;  %2836 = vmatpush3.bf16.msra.mxu0 %v3696_v35  ;;  %v1189_v63 = vor.u32 %v1188_v57, %v1185_v56  ;;  %v1234_v23 = vshll.u32 %v1122_v51, 16  ;;  %v1955_v37 = vshll.u32 %v1918_v9, 16  ;;  %v1941_v52 = vshll.u32 %v1916_v28, 16 }
 0x1b0   : > { %1440 = vmatmul.mubr.bf16.gmra.mrb[4].mxu1 %v2494_v44  ;;  %2837 = vmatprep.subr.bf16.mxu0 %v3710_v25  ;;  %v1209_v6 = vsel %vm3606_vm0, %v3723_v61, %v1208_v21  ;;  %v3787_v36 = vrot.slane %v1231_v16, 4  ;;  %v3048_v44 = vld [vmem:[%s3997_s3 + $0x28] sm:$0xff]   ;;  %v1222_v57 = vrot.slane %v1220_v24, 5  ;;  %v2517_v51 = vcombine.high %v3562_v53, %v3592_v12 }
 0x1b1   : > { %2756 = vmatpush3.bf16.msra.mxu1 %v3033_v8  ;;  %v3740_v32 = vrot.slane %v1189_v63, 4  ;;  %v3742_v5 = vld [vmem:[#allocation2 + $0x60] sm:$0xff]  ;;  %v3795_v8 = vld [vmem:[%s3997_s3 + $0x1f0] sm:$0xff]   ;;  %v1236_v41 = vrot.slane %v1234_v23, 5  ;;  %v1957_v63 = vrot.slane %v1955_v37, 5 }
 0x1b2   : > { %2757 = vmatprep.subr.bf16.mxu1 %v3035_v58  ;;  %v2577_v55 = vcombine.high %v3615_v47, %v3742_v5  ;;  %v2576_v10 = vcombine.low %v3615_v47, %v3742_v5  ;;  %v1211_v13 = vshrl.u32 %v3742_v5, 16  ;;  %v1214_v48 = vshll.u32 %v3742_v5, 16  ;;  %v3050_v58 = vld [vmem:[%s3997_s3 + $0x70] sm:$0xff]  }
 0x1b3   : > { %2838 = vmatpush3.bf16.msra.mxu0 %v3729_v62  ;;  %v1195_v40 = vsel %vm3606_vm0, %v3740_v32, %v1194_v4  ;;  %v1237_v26 = vsel %vm3606_vm0, %v3787_v36, %v1236_v41  ;;  %v1958_v4 = vsel %vm3606_vm0, %v3686_v27, %v1957_v63  ;;  %v3056_v27 = vld [vmem:[%s3997_s3 + $0x78] sm:$0xff]  }
 0x1b4   : > { %v2497_v17 = vcombine.high %v1195_v40, %v1209_v6  ;;  %2839 = vmatprep.subr.bf16.mxu0 %v3735_v33  ;;  %v2496_v11 = vcombine.low %v1195_v40, %v1209_v6  ;;  %1890 = vmatprep.mubr.bf16.mxu0 %v2577_v55  ;;  %v1213_v50 = vrot.slane %v1211_v13, 4  ;;  %v1216_v34 = vrot.slane %v1214_v48, 5  ;;  %v3053_v55 = vld [vmem:[%s3997_s3 + $0x30] sm:$0xff]   ;;  %v3058_v13 = vld [vmem:[%s3997_s3 + $0x38] sm:$0xff]  }
 0x1b5   : > { %2758 = vmatpush3.bf16.msra.mxu1 %v3037_v2  ;;  %v1943_v2 = vrot.slane %v1941_v52, 5  ;;  %v2519_v48 = vcombine.high %v3621_v49, %v3586_v39 }
 0x1b6   : > { %1447 = vmatprep.mubr.bf16.mxu1 %v2497_v17  ;;  %2759 = vmatprep.subr.bf16.mxu1 %v3040_v7  ;;  %v3772_v31 = vld [vmem:[#allocation2 + $0x80] sm:$0xff]  ;;  %v1217_v46 = vor.u32 %v1216_v34, %v1213_v50 }
 0x1b7   : > { %1891 = vmatmul.mubr.bf16.gmra.mrb[40].mxu0 %v2576_v10  ;;  %v2579_v38 = vcombine.high %v3679_v22, %v3772_v31  ;;  %v2578_v7 = vcombine.low %v3679_v22, %v3772_v31  ;;  %v1944_v40 = vsel %vm3606_vm0, %v3613_v45, %v1943_v2  ;;  %v3839_v45 = vld [vmem:[%s3997_s3 + $0x1b8] sm:$0xff]  }
 0x1b8   : > { %1448 = vmatmul.mubr.bf16.gmra.mrb[8].mxu1 %v2496_v11  ;;  %2840 = vmatpush3.bf16.msra.mxu0 %v3763_v3  ;;  %v3798_v56 = vrot.slane %v1217_v46, 4  ;;  %v2629_v10 = vcombine.high %v1944_v40, %v1958_v4  ;;  %v2628_v17 = vcombine.low %v1944_v40, %v1958_v4  ;;  %v2516_v11 = vcombine.low %v3562_v53, %v3592_v12  ;;  %v1922_v12 = vld [vmem:[#allocation2 + $0x48] sm:$0x11] }
 0x1b9   : > { %2760 = vmatpush3.bf16.msra.mxu1 %v3043_v19  ;;  %1898 = vmatprep.mubr.bf16.mxu0 %v2579_v38  ;;  %v2521_v53 = vcombine.high %v3684_v14, %v3615_v47 }
 0x1ba   : > { %2761 = vmatprep.subr.bf16.mxu1 %v3046_v20  ;;  %2841 = vmatprep.subr.bf16.mxu0 %v3777_v59  ;;  %v1223_v21 = vsel %vm3606_vm0, %v3798_v56, %v1222_v57 }
 0x1bb   : > { %v2499_v6 = vcombine.high %v1223_v21, %v1237_v26  ;;  %v2498_v9 = vcombine.low %v1223_v21, %v1237_v26 }
 0x1bc   : > { %2842 = vmatpush3.bf16.msra.mxu0 %v3785_v43 }
 0x1bd   : > { %2762 = vmatpush3.bf16.msra.mxu1 %v3048_v44  ;;  %2843 = vmatprep.subr.bf16.mxu0 %v3795_v8 }
 0x1be   : > { %2763 = vmatprep.subr.bf16.mxu1 %v3050_v58  ;;  %1455 = vmatprep.mubr.bf16.mxu1 %v2499_v6 }
 0x1bf   : > { %1899 = vmatmul.mubr.bf16.gmra.mrb[44].mxu0 %v2578_v7 }
 0x1c0   : > { %1456 = vmatmul.mubr.bf16.gmra.mrb[12].mxu1 %v2498_v9  ;;  %2844 = vmatpush3.bf16.msra.mxu0 %v3813_v1 }
 0x1c1   : > { %2764 = vmatpush3.bf16.msra.mxu1 %v3053_v55  ;;  %2236 = vmatprep.mubr.bf16.mxu0 %v2629_v10 }
 0x1c2   : > { %1632 = vmatprep.mubr.bf16.mxu1 %v2517_v51  ;;  %2765 = vmatprep.subr.bf16.mxu1 %v3056_v27 }
 0x1c3   : > { %2845 = vmatprep.subr.bf16.mxu0 %v3057_v30 }
 0x1c4   : > { %2846 = vmatpush3.bf16.msra.mxu0 %v3839_v45 }
 0x1c5   : > { %2766 = vmatpush3.bf16.msra.mxu1 %v3058_v13 }
 0x1c6   : > { %2909 = vmatprep.subr.bf16.mxu1 %v3495_v18  ;;  %v2518_v18 = vcombine.low %v3621_v49, %v3586_v39  ;;  %v2523_v39 = vcombine.high %v3742_v5, %v3679_v22 }
 0x1c7   : > { %2237 = vmatmul.mubr.bf16.vlgmr.msra.gmra.mrb[48].mxu0 %v2628_v17 }
 0x1c8   : > { %1633 = vmatmul.mubr.bf16.vlgmr.msra.gmra.mrb[16].mxu1 %v2516_v11 }
 0x1c9   : > { %2917 = vmatpush3.bf16.msra.mxu1 %v3637_v60  ;;  %1640 = vmatprep.mubr.bf16.mxu1 %v2519_v48  ;;  %v1920_v60 = vld [vmem:[#allocation2 + $0x38] sm:$0x11] }
 0x1ca   : > { %2910 = vmatprep.subr.bf16.mxu1 %v3646_v0  ;;  %v2520_v0 = vcombine.low %v3684_v14, %v3615_v47  ;;  %v1969_v49 = vshll.u32 %v1920_v60, 16  ;;  %v2030_v47 = vshrl.u32 %v3772_v31, 16  ;;  %v2033_v14 = vshll.u32 %v3772_v31, 16 }
 0x1cc   : > { %v2032_v50 = vrot.slane %v2030_v47, 4  ;;  %v2035_v28 = vrot.slane %v2033_v14, 5 }
 0x1cd   : > { %2918 = vmatpush3.bf16.msra.mxu1 %v3662_v54  ;;  %v1983_v54 = vshll.u32 %v1922_v12, 16 }
 0x1ce   : > { %2911 = vmatprep.subr.bf16.mxu1 %v3676_v15 }
 0x1cf   : > { %v1985_v15 = vrot.slane %v1983_v54, 5 }
 0x1d0   : > { %1641 = vmatmul.mubr.bf16.gmra.mrb[20].mxu1 %v2518_v18 }
 0x1d1   : > { %2919 = vmatpush3.bf16.msra.mxu1 %v3696_v35  ;;  %1648 = vmatprep.mubr.bf16.mxu1 %v2521_v53  ;;  %v1926_v35 = vld [vmem:[#allocation2 + $0x68] sm:$0x11] }
 0x1d2   : > { %2912 = vmatprep.subr.bf16.mxu1 %v3710_v25  ;;  %v1971_v25 = vrot.slane %v1969_v49, 5  ;;  %v2011_v19 = vshll.u32 %v1926_v35, 16 }
 0x1d4   : > { %v1972_v16 = vsel %vm3606_vm0, %v3668_v42, %v1971_v25  ;;  %v2013_v31 = vrot.slane %v2011_v19, 5  ;;  %v1928_v42 = vld [vmem:[#allocation2 + $0x78] sm:$0x11] }
 0x1d5   : > { %2920 = vmatpush3.bf16.msra.mxu1 %v3729_v62  ;;  %v1986_v62 = vsel %vm3606_vm0, %v3740_v32, %v1985_v15 }
 0x1d6   : > { %2913 = vmatprep.subr.bf16.mxu1 %v3735_v33  ;;  %v1924_v33 = vld [vmem:[#allocation2 + $0x58] sm:$0x11]  ;;  %v2631_v20 = vcombine.high %v1972_v16, %v1986_v62  ;;  %v2630_v24 = vcombine.low %v1972_v16, %v1986_v62 }
 0x1d7   : > { %v1997_v32 = vshll.u32 %v1924_v33, 16 }
 0x1d8   : > { %1649 = vmatmul.mubr.bf16.gmra.mrb[24].mxu1 %v2520_v0 }
 0x1d9   : > { %2921 = vmatpush3.bf16.msra.mxu1 %v3763_v3  ;;  %1656 = vmatprep.mubr.bf16.mxu1 %v2523_v39  ;;  %v2522_v3 = vcombine.low %v3742_v5, %v3679_v22  ;;  %v1999_v34 = vrot.slane %v1997_v32, 5  ;;  %v2014_v22 = vsel %vm3606_vm0, %v3798_v56, %v2013_v31  ;;  %v2036_v5 = vor.u32 %v2035_v28, %v2032_v50 }
 0x1da   : > { %2914 = vmatprep.subr.bf16.mxu1 %v3777_v59  ;;  %v1930_v59 = vld [vmem:[#allocation2 + $0x88] sm:$0x11] }
 0x1db   : > { %v2000_v23 = vsel %vm3606_vm0, %v3723_v61, %v1999_v34  ;;  %v2039_v37 = vshll.u32 %v1930_v59, 16  ;;  %v2037_v46 = vrot.slane %v2036_v5, 4 }
 0x1dc   : > { %v2633_v38 = vcombine.high %v2000_v23, %v2014_v22  ;;  %v2632_v56 = vcombine.low %v2000_v23, %v2014_v22 }
 0x1dd   : > { %2922 = vmatpush3.bf16.msra.mxu1 %v3785_v43  ;;  %v2025_v43 = vshll.u32 %v1928_v42, 16  ;;  %v2041_v52 = vrot.slane %v2039_v37, 5 }
 0x1de   : > { %2915 = vmatprep.subr.bf16.mxu1 %v3795_v8 }
 0x1df   : > { %v2027_v44 = vrot.slane %v2025_v43, 5  ;;  %v2042_v8 = vsel %vm3606_vm0, %v2037_v46, %v2041_v52 }
 0x1e0   : > { %1657 = vmatmul.mubr.bf16.gmra.mrb[28].mxu1 %v2522_v3 }
 0x1e1   : > { %2923 = vmatpush3.bf16.msra.mxu1 %v3813_v1  ;;  %2244 = vmatprep.mubr.bf16.mxu1 %v2631_v20  ;;  %v2028_v57 = vsel %vm3606_vm0, %v3787_v36, %v2027_v44 }
 0x1e2   : > { %2916 = vmatprep.subr.bf16.mxu1 %v3057_v30  ;;  %v2635_v41 = vcombine.high %v2028_v57, %v2042_v8  ;;  %v2634_v61 = vcombine.low %v2028_v57, %v2042_v8 }
 0x1e5   : > { %2924 = vmatpush3.bf16.msra.mxu1 %v3839_v45 }
 0x1e8   : > { %2245 = vmatmul.mubr.bf16.vlgmr.msra.gmra.mrb[32].mxu1 %v2630_v24 }
 0x1e9   : > { %2252 = vmatprep.mubr.bf16.mxu1 %v2633_v38 }
 0x1f0   : > { %2253 = vmatmul.mubr.bf16.gmra.mrb[36].mxu1 %v2632_v56 }
 0x1f1   : > { %2260 = vmatprep.mubr.bf16.mxu1 %v2635_v41 }
 0x1f8   : > { %2261 = vmatmul.mubr.bf16.gmra.mrb[40].mxu1 %v2634_v61  ;;  %v3907_v61 = vld [vmem:[%s3998_s4] ss:$0 sm:$0xff] }
 0x279   : > { %v2807_v58 = vpop.f32.mrb[32].mxu0 }
 0x27a   : > { %v2727_v63 = vpop.f32.mrb[0].mxu1  ;;  %v2808_v21 = vpop.f32.mrb[33].mxu0 }
 0x27b   : > { %v2809_v26 = vadd.f32 %v2808_v21, %v2807_v58  ;;  %v2728_v1 = vpop.f32.mrb[1].mxu1  ;;  %v2810_v2 = vpop.f32.mrb[34].mxu0 }
 0x27c   : > { %v2729_v4 = vadd.f32 %v2728_v1, %v2727_v63  ;;  %v2730_v6 = vpop.f32.mrb[2].mxu1  ;;  %v2811_v7 = vpop.f32.mrb[35].mxu0 }
 0x27d   : > { %v2812_v9 = vadd.f32 %v2811_v7, %v2810_v2  ;;  %v2731_v55 = vpop.f32.mrb[3].mxu1 }
 0x27e   : > { %v2732_v40 = vadd.f32 %v2731_v55, %v2730_v6 }
 0x281   : > { %v2813_v27 = vpop.f32.mrb[36].mxu0 }
 0x282   : > { %v2814_v29 = vpop.f32.mrb[37].mxu0 }
 0x283   : > { %v2733_v36 = vpop.f32.mrb[4].mxu1  ;;  %v3893_v10 = vadd.f32 %v2814_v29, %v2813_v27  ;;  %v2816_v30 = vpop.f32.mrb[38].mxu0 }
 0x284   : > { %v2734_v51 = vpop.f32.mrb[5].mxu1  ;;  %v2817_v45 = vpop.f32.mrb[39].mxu0 }
 0x285   : > { %v2735_v13 = vadd.f32 %v2734_v51, %v2733_v36  ;;  %v2736_v17 = vpop.f32.mrb[6].mxu1  ;;  %v3895_v11 = vadd.f32 %v2817_v45, %v2816_v30 }
 0x286   : > { %v2737_v48 = vpop.f32.mrb[7].mxu1 }
 0x287   : > { %v2738_v18 = vadd.f32 %v2737_v48, %v2736_v17 }
 0x28a   : > { %v2819_v53 = vpop.f32.mrb[40].mxu0 }
 0x28b   : > { %v2739_v12 = vpop.f32.mrb[8].mxu1  ;;  %v2820_v60 = vpop.f32.mrb[41].mxu0 }
 0x28c   : > { %v3897_v0 = vadd.f32 %v2820_v60, %v2819_v53  ;;  %v2740_v54 = vpop.f32.mrb[9].mxu1  ;;  %v2822_v39 = vpop.f32.mrb[42].mxu0 }
 0x28d   : > { %v2741_v49 = vadd.f32 %v2740_v54, %v2739_v12  ;;  %v2742_v15 = vpop.f32.mrb[10].mxu1  ;;  %v2823_v35 = vpop.f32.mrb[43].mxu0 }
 0x28e   : > { %v3899_v25 = vadd.f32 %v2823_v35, %v2822_v39  ;;  %v2743_v62 = vpop.f32.mrb[11].mxu1 }
 0x28f   : > { %v2744_v47 = vadd.f32 %v2743_v62, %v2742_v15 }
 0x292   : > { %v2825_v14 = vpop.f32.mrb[44].mxu0 }
 0x293   : > { %v2745_v33 = vpop.f32.mrb[12].mxu1  ;;  %v2826_v3 = vpop.f32.mrb[45].mxu0 }
 0x294   : > { %v3901_v16 = vadd.f32 %v2826_v3, %v2825_v14  ;;  %v2746_v19 = vpop.f32.mrb[13].mxu1  ;;  %v2828_v20 = vpop.f32.mrb[46].mxu0 }
 0x295   : > { %v2747_v32 = vadd.f32 %v2746_v19, %v2745_v33  ;;  %v2748_v50 = vpop.f32.mrb[14].mxu1  ;;  %v2829_v28 = vpop.f32.mrb[47].mxu0 }
 0x296   : > { %v2830_v31 = vadd.f32 %v2829_v28, %v2828_v20  ;;  %v2749_v59 = vpop.f32.mrb[15].mxu1 }
 0x297   : > { %v2750_v34 = vadd.f32 %v2749_v59, %v2748_v50 }
 0x29a   : > { %v2847_v22 = vpop.f32.mrb[48].mxu0 }
 0x29b   : > { %v2767_v5 = vpop.f32.mrb[16].mxu1  ;;  %v2848_v42 = vpop.f32.mrb[49].mxu0 }
 0x29c   : > { %v2849_v24 = vadd.f32 %v2848_v42, %v2847_v22  ;;  %v2768_v23 = vpop.f32.mrb[17].mxu1  ;;  %v2850_v37 = vpop.f32.mrb[50].mxu0 }
 0x29d   : > { %v2769_v38 = vadd.f32 %v2768_v23, %v2767_v5  ;;  %v2770_v43 = vpop.f32.mrb[18].mxu1  ;;  %v2851_v46 = vpop.f32.mrb[51].mxu0 }
 0x29e   : > { %v2852_v52 = vadd.f32 %v2851_v46, %v2850_v37  ;;  %v2771_v44 = vpop.f32.mrb[19].mxu1 }
 0x29f   : > { %v1635_v8 = vadd.f32 %v2769_v38, %v2729_v4  ;;  %v2772_v56 = vadd.f32 %v2771_v44, %v2770_v43 }
 0x2a1   : > { %v1907_v57 = vadd.f32 %v2809_v26, %v1635_v8  ;;  %v1638_v41 = vadd.f32 %v2772_v56, %v2732_v40 }
 0x2a3   : > { %v2269_v58 = vadd.f32 %v2849_v24, %v1907_v57  ;;  %v1908_v63 = vadd.f32 %v2812_v9, %v1638_v41  ;;  %v2773_v21 = vpop.f32.mrb[20].mxu1 }
 0x2a4   : > { %v2774_v1 = vpop.f32.mrb[21].mxu1 }
 0x2a5   : > { %v2284_v2 = vadd.f32 %v3907_v61, %v2269_v58  ;;  %v2270_v6 = vadd.f32 %v2852_v52, %v1908_v63  ;;  %v2775_v7 = vadd.f32 %v2774_v1, %v2773_v21  ;;  %v2776_v4 = vpop.f32.mrb[22].mxu1 }
 0x2a6   : > { %v2777_v55 = vpop.f32.mrb[23].mxu1 }
 0x2a7   : > { %v2292_v26 = vmax.f32 %v2284_v2, 0.0  ;;  %v2285_v40 = vadd.f32 %v3907_v61, %v2270_v6  ;;  %v1643_v27 = vadd.f32 %v2775_v7, %v2735_v13  ;;  %v2778_v29 = vadd.f32 %v2777_v55, %v2776_v4 }
 0x2a9   : > { %2301 = vst.msk [vmem:[%s3913_s23] sm:$0xff] %vm2300_vm1, %v2292_v26  ;;  %v2293_v9 = vmax.f32 %v2285_v40, 0.0  ;;  %v1646_v36 = vadd.f32 %v2778_v29, %v2738_v18  ;;  %v1909_v30 = vadd.f32 %v3893_v10, %v1643_v27 }
 0x2ab   : > { %2302 = vst.msk [vmem:[%s3913_s23 + $0x8] sm:$0xff] %vm2300_vm1, %v2293_v9  ;;  %v2779_v51 = vpop.f32.mrb[24].mxu1  ;;  %v1910_v45 = vadd.f32 %v3895_v11, %v1646_v36 }
 0x2ac   : > { %v2780_v17 = vpop.f32.mrb[25].mxu1 }
 0x2ad   : > { %v2781_v48 = vadd.f32 %v2780_v17, %v2779_v51  ;;  %v2782_v53 = vpop.f32.mrb[26].mxu1 }
 0x2ae   : > { %v2783_v13 = vpop.f32.mrb[27].mxu1 }
 0x2af   : > { %v1651_v12 = vadd.f32 %v2781_v48, %v2741_v49  ;;  %v2784_v60 = vadd.f32 %v2783_v13, %v2782_v53 }
 0x2b1   : > { %v1654_v54 = vadd.f32 %v2784_v60, %v2744_v47  ;;  %v1911_v39 = vadd.f32 %v3897_v0, %v1651_v12 }
 0x2b3   : > { %v2785_v15 = vpop.f32.mrb[28].mxu1  ;;  %v1912_v35 = vadd.f32 %v3899_v25, %v1654_v54 }
 0x2b4   : > { %v2786_v18 = vpop.f32.mrb[29].mxu1 }
 0x2b5   : > { %v2787_v62 = vadd.f32 %v2786_v18, %v2785_v15  ;;  %v2788_v10 = vpop.f32.mrb[30].mxu1 }
 0x2b6   : > { %v2789_v14 = vpop.f32.mrb[31].mxu1 }
 0x2b7   : > { %v1659_v33 = vadd.f32 %v2787_v62, %v2747_v32  ;;  %v2790_v3 = vadd.f32 %v2789_v14, %v2788_v10 }
 0x2b9   : > { %v1662_v19 = vadd.f32 %v2790_v3, %v2750_v34  ;;  %v1913_v11 = vadd.f32 %v3901_v16, %v1659_v33 }
 0x2bb   : > { %v2853_v20 = vpop.f32.mrb[32].mxu1  ;;  %v1914_v50 = vadd.f32 %v2830_v31, %v1662_v19 }
 0x2bc   : > { %v2854_v49 = vpop.f32.mrb[33].mxu1 }
 0x2bd   : > { %v2855_v28 = vadd.f32 %v2854_v49, %v2853_v20  ;;  %v2856_v47 = vpop.f32.mrb[34].mxu1 }
 0x2be   : > { %v2857_v0 = vpop.f32.mrb[35].mxu1 }
 0x2bf   : > { %v2271_v59 = vadd.f32 %v2855_v28, %v1909_v30  ;;  %v2858_v22 = vadd.f32 %v2857_v0, %v2856_v47 }
 0x2c1   : > { %v2286_v25 = vadd.f32 %v3907_v61, %v2271_v59  ;;  %v2272_v5 = vadd.f32 %v2858_v22, %v1910_v45 }
 0x2c3   : > { %v2294_v42 = vmax.f32 %v2286_v25, 0.0  ;;  %v2287_v32 = vadd.f32 %v3907_v61, %v2272_v5  ;;  %v2859_v24 = vpop.f32.mrb[36].mxu1 }
 0x2c4   : > { %v2860_v34 = vpop.f32.mrb[37].mxu1 }
 0x2c5   : > { %2303 = vst.msk [vmem:[%s3913_s23 + $0x10] sm:$0xff] %vm2300_vm1, %v2294_v42  ;;  %v2295_v16 = vmax.f32 %v2287_v32, 0.0  ;;  %v2861_v31 = vadd.f32 %v2860_v34, %v2859_v24  ;;  %v2862_v23 = vpop.f32.mrb[38].mxu1 }
 0x2c6   : > { %v2863_v37 = vpop.f32.mrb[39].mxu1 }
 0x2c7   : > { %2304 = vst.msk [vmem:[%s3913_s23 + $0x18] sm:$0xff] %vm2300_vm1, %v2295_v16  ;;  %v2273_v38 = vadd.f32 %v2861_v31, %v1911_v39  ;;  %v2864_v43 = vadd.f32 %v2863_v37, %v2862_v23 }
 0x2c9   : > { %v2288_v46 = vadd.f32 %v3907_v61, %v2273_v38  ;;  %v2274_v52 = vadd.f32 %v2864_v43, %v1912_v35 }
 0x2cb   : > { %v2296_v44 = vmax.f32 %v2288_v46, 0.0  ;;  %v2289_v8 = vadd.f32 %v3907_v61, %v2274_v52  ;;  %v2865_v56 = vpop.f32.mrb[40].mxu1 }
 0x2cc   : > { %v2866_v57 = vpop.f32.mrb[41].mxu1 }
 0x2cd   : > { %2305 = vst.msk [vmem:[%s3913_s23 + $0x20] sm:$0xff] %vm2300_vm1, %v2296_v44  ;;  %v2297_v41 = vmax.f32 %v2289_v8, 0.0  ;;  %v2867_v58 = vadd.f32 %v2866_v57, %v2865_v56  ;;  %v2868_v63 = vpop.f32.mrb[42].mxu1 }
 0x2ce   : > { %v2869_v21 = vpop.f32.mrb[43].mxu1 }
 0x2cf   : > { %2306 = vst.msk [vmem:[%s3913_s23 + $0x28] sm:$0xff] %vm2300_vm1, %v2297_v41  ;;  %v2275_v1 = vadd.f32 %v2867_v58, %v1913_v11  ;;  %v2870_v2 = vadd.f32 %v2869_v21, %v2868_v63 }
 0x2d1   : > { %v2290_v6 = vadd.f32 %v3907_v61, %v2275_v1  ;;  %v2276_v7 = vadd.f32 %v2870_v2, %v1914_v50 }
 0x2d3   : > { %v2298_v4 = vmax.f32 %v2290_v6, 0.0  ;;  %v2291_v55 = vadd.f32 %v3907_v61, %v2276_v7 }
 0x2d5   : > { %2307 = vst.msk [vmem:[%s3913_s23 + $0x30] sm:$0xff] %vm2300_vm1, %v2298_v4  ;;  %v2299_v26 = vmax.f32 %v2291_v55, 0.0 }
 0x2d7   : > { %2308 = vst.msk [vmem:[%s3913_s23 + $0x38] sm:$0xff] %vm2300_vm1, %v2299_v26 }
 0x2d8   : > { %3080 = shalt.err (!%p3077_p3)
}
 0x2d9   : > { %s3081_s30 = scalar_lea.hbm %s3943_s15, 1024  ;;  %s3085_s8 = scalar_lea.hbm %s3999_s5, 2048 }
 0x2da   : > { %p3082_p4 = scmp.ne.s32.totalorder %s3943_s15, %s3081_s30  ;;  %p3086_p9 = scmp.lt.u32.totalorder %s3943_s15, %s3999_s5 }
 0x2db   : > { %p3087_p10 = scmp.lt.u32.totalorder %s3085_s8, %s3081_s30  ;;  %p3089_p12 = scmp.lt.u32.totalorder %s3081_s30, %s3943_s15 }
 0x2dc   : > { %p3083_p7 = pnand %p3082_p4, %p3204_p5 }
 0x2dd   : > { %p3088_p11 = por %p3087_p10, %p3086_p9 }
 0x2de   : > { %p3084_p8 = pneg %p3083_p7 }
 0x2df   : > { %p3090_p13 = por %p3089_p12, %p3088_p11 }
 0x2e1   : > { %p3091_p0 = pnand %p3090_p13, %p3084_p8 }
 0x2e3   : > { %3094 = shalt.err (!%p3091_p0)
}
 0x2e4   : > { %s3134_s23 = smov 128   ;;  %s3135_s11 = smov 8  }
 0x2e5   : > { %2925 = dma.vmem_to_hbm [thread:$0]  (%p3204_p5), %s3945_s12, 1024, %s3943_s15, %s3953_s22, %s3134_s23, %s3134_s23, %s3135_s11  }
 0x2e6 PF: > { %p2931_p1 = scmp.ge.s32.totalorder %s3129_s21, 2  ;;  %s2338_s13 = sand.u32 1, %s3117_s18  }
 0x2e7   : > { %s2339_s14 = scalar_lea.sflag [#allocation4], %s2338_s13 }
 0x2e8   : > { %p2928_p2 = pnand %p2931_p1, %p3208_p6 }
 0x2ea   : > { %3112 = dma.done.wait (!%p2928_p2), %s2339_s14, 1024  }
 0x2eb   : > { %3114 = vsyncadd (!%p2928_p2), %s2339_s14, 4294966272  ;;  %p15_p3 = scmp.ge.s32.totalorder %s3191_s24, 4   ;;  %s4010_s18 = smov %s3121_s19 }
 0x2ec   : > { %s4011_s19 = smov %s3125_s20  ;;  %s4012_s20 = smov %s3202_s27 }
 0x2ed   : > { %s4013_s21 = smov %s3191_s24  ;;  %17 = sbr.rel (!%p15_p3) target bundleno = 3 (0x3), region = 79 }
 0x2f4   :  { %2344 = vsyncpa [#allocation4], 1 }
 0x2f5   :  { %2346 = vsyncpa [#allocation4 + $0x1], 1 }

</bundles_post_ra>
